<compile_context>
chip_gen: v7x
topology: tpu7x:2x2x1
jax: 0.10.0
libtpu: 0.0.40
codegen_flags: <defaults>
</compile_context>

<pallas_src>
import functools
import math

import jax
import jax.numpy as jnp
from jax.experimental import pallas as pl
from jax.experimental.pallas import tpu as pltpu


# ----------------------------- fused linear -----------------------------

def _linear_kernel(*refs, relu, has_bias, add_input_residual):
    if has_bias:
        x_ref, w_ref, b_ref, o_ref = refs
    else:
        x_ref, w_ref, o_ref = refs
        b_ref = None
    x = x_ref[...]
    y = jnp.dot(x, w_ref[...], preferred_element_type=jnp.float32)
    if b_ref is not None:
        y = y + b_ref[...]
    if relu:
        y = jnp.maximum(y, 0.0)
    if add_input_residual:          # fused residual (FFN): relu(xW+b) + x
        y = y + x
    o_ref[...] = y.astype(o_ref.dtype)


def linear(x2d, w, b=None, *, relu=False, add_input_residual=False, block_rows=512):
    """x2d: (M, K), w: (K, N), optional b: (N,) -> (M, N).  Row-tiled & pipelined."""
    M, K = x2d.shape
    N = w.shape[1]
    tile_m = M if M <= block_rows else block_rows
    in_specs = [
        pl.BlockSpec((tile_m, K), lambda i: (i, 0)),
        pl.BlockSpec((K, N), lambda i: (0, 0)),
    ]
    args = [x2d, w]
    if b is not None:
        in_specs.append(pl.BlockSpec((1, N), lambda i: (0, 0)))
        args.append(b.reshape(1, N))
    return pl.pallas_call(
        functools.partial(_linear_kernel, relu=relu, has_bias=b is not None,
                          add_input_residual=add_input_residual),
        out_shape=jax.ShapeDtypeStruct((M, N), jnp.float32),
        grid=(pl.cdiv(M, tile_m),),
        in_specs=in_specs,
        out_specs=pl.BlockSpec((tile_m, N), lambda i: (i, 0)),
        compiler_params=pltpu.CompilerParams(dimension_semantics=("parallel",)),
    )(*args)


# ----------------------------- layernorm -----------------------------

def _layernorm_kernel(x_ref, g_ref, b_ref, o_ref, *, eps):
    x = x_ref[...]
    mean = jnp.mean(x, axis=-1, keepdims=True)
    xc = x - mean
    var = jnp.mean(xc * xc, axis=-1, keepdims=True)   # biased variance (torch LN)
    inv = jax.lax.rsqrt(var + eps)
    o_ref[...] = (xc * inv * g_ref[...] + b_ref[...]).astype(o_ref.dtype)


def layernorm(x2d, gamma, beta, *, eps=1e-5, block_rows=512):
    M, D = x2d.shape
    tile_m = M if M <= block_rows else block_rows
    return pl.pallas_call(
        functools.partial(_layernorm_kernel, eps=eps),
        out_shape=jax.ShapeDtypeStruct((M, D), jnp.float32),
        grid=(pl.cdiv(M, tile_m),),
        in_specs=[
            pl.BlockSpec((tile_m, D), lambda i: (i, 0)),
            pl.BlockSpec((1, D), lambda i: (0, 0)),
            pl.BlockSpec((1, D), lambda i: (0, 0)),
        ],
        out_specs=pl.BlockSpec((tile_m, D), lambda i: (i, 0)),
        compiler_params=pltpu.CompilerParams(dimension_semantics=("parallel",)),
    )(x2d, gamma.reshape(1, D), beta.reshape(1, D))


# ----------------------------- relative multi-head attention -----------------------------

def _rel_attn_kernel(x_ref, q_ref, v_ref, pos_ref, rr_ref, rw_ref, mask_ref, o_ref,
                     *, n_head, head_dim, seq_len, inv_scale):
    L = seq_len
    x = x_ref[0]           # (L, d_model): keys (TENER uses unprojected x) + residual
    q_all = q_ref[0]       # (L, d_model)
    v_all = v_ref[0]       # (L, d_model)
    pos = pos_ref[...]     # (P, hd): rel-pos rows for offsets -L..L-1, rows >= 2L are 0
    m = mask_ref[0]        # (1, L) float key mask (1 = valid, 0 = pad)
    P = pos.shape[0]

    head_outs = []
    for h in range(n_head):                     # n_head is small and static -> unrolled
        lo = h * head_dim
        hi = lo + head_dim
        q_h = q_all[:, lo:hi]                   # (L, hd)
        k_h = x[:, lo:hi]
        v_h = v_all[:, lo:hi]
        rr = rr_ref[h:h + 1, :]                 # (1, hd) r_r_bias[h]
        rw = rw_ref[h:h + 1, :]                 # (1, hd) r_w_bias[h]

        # AC[q, k] = (q + r_r_bias) . k          -- one MXU matmul
        ac = jax.lax.dot_general(q_h + rr, k_h, (((1,), (1,)), ((), ())),
                                 preferred_element_type=jnp.float32)       # (L, L)

        # BD: score against all 2L relative positions with one MXU matmul, then apply
        # TENER's `_shift`:  BD[q, k] = bd_full[q, k - q + L].  Done with a single
        # per-row (strided) lane roll on the XLU; columns >= 2L of pos are zero pad.
        bd_full = jax.lax.dot_general(q_h + rw, pos, (((1,), (1,)), ((), ())),
                                      preferred_element_type=jnp.float32)  # (L, P)
        bd = pltpu.roll(bd_full, P - L, axis=1, stride=1, stride_axis=0)[:, :L]

        attn = ac + bd
        if inv_scale != 1.0:
            attn = attn * inv_scale
        # large finite negative instead of -inf: no NaN rows for fully-padded sequences
        attn = jnp.where(m == 0.0, -1e30, attn)
        mx = jnp.max(attn, axis=-1, keepdims=True)
        p = jnp.exp(attn - mx)
        denom = jnp.sum(p, axis=-1, keepdims=True)
        p = p * pl.reciprocal(denom, approx=True)           # EUP: frees VALU slots
        head_outs.append(jnp.dot(p, v_h, preferred_element_type=jnp.float32))

    # concat heads back to d_model (lane-dense store) and fuse the residual add (x).
    o_ref[0] = (jnp.concatenate(head_outs, axis=-1) + x).astype(o_ref.dtype)


def rel_attention(x, q, v, pos_padded, r_r_bias, r_w_bias, maskf, *, n_head, scale):
    """x, q, v: (B, L, d_model); pos_padded: (P, hd); biases: (H, hd); maskf: (B, 1, L).

    Returns attention output with the residual (x) already added: (B, L, d_model).
    """
    B, L, d_model = x.shape
    hd = d_model // n_head
    P = pos_padded.shape[0]
    return pl.pallas_call(
        functools.partial(_rel_attn_kernel, n_head=n_head, head_dim=hd,
                          seq_len=L, inv_scale=1.0 / scale),
        out_shape=jax.ShapeDtypeStruct((B, L, d_model), jnp.float32),
        grid=(B,),
        in_specs=[
            pl.BlockSpec((1, L, d_model), lambda b: (b, 0, 0)),   # x (keys + residual)
            pl.BlockSpec((1, L, d_model), lambda b: (b, 0, 0)),   # q
            pl.BlockSpec((1, L, d_model), lambda b: (b, 0, 0)),   # v
            pl.BlockSpec((P, hd), lambda b: (0, 0)),              # rel-pos table (shared)
            pl.BlockSpec((n_head, hd), lambda b: (0, 0)),         # r_r_bias
            pl.BlockSpec((n_head, hd), lambda b: (0, 0)),         # r_w_bias
            pl.BlockSpec((1, 1, L), lambda b: (b, 0, 0)),         # key mask
        ],
        out_specs=pl.BlockSpec((1, L, d_model), lambda b: (b, 0, 0)),
        compiler_params=pltpu.CompilerParams(dimension_semantics=("parallel",)),
    )(x, q, v, pos_padded, r_r_bias, r_w_bias, maskf)


# ----------------------------- parameter setup -----------------------------

def rel_sinusoidal_weights(init_size, embedding_dim, padding_idx):
    """RelativeSinusoidalPositionalEmbedding.get_embedding(init_size + 1, ...)."""
    num_embeddings = init_size + 1
    half_dim = embedding_dim // 2
    emb = math.log(10000.0) / (half_dim - 1)
    freq = jnp.exp(jnp.arange(half_dim, dtype=jnp.float32) * -emb)
    lo = -num_embeddings // 2            # Python floor division, as in the torch code
    hi = num_embeddings // 2
    pos = jnp.arange(lo, hi, dtype=jnp.float32)
    ang = pos[:, None] * freq[None, :]
    weights = jnp.concatenate([jnp.sin(ang), jnp.cos(ang)], axis=1)
    if embedding_dim % 2 == 1:
        weights = jnp.concatenate([weights, jnp.zeros((num_embeddings, 1))], axis=1)
    weights = weights.at[padding_idx].set(0.0)
    origin_shift = num_embeddings // 2 + 1
    return weights, origin_shift


def init_params(key, embed_size, d_model, n_head, tag_size):
    hd = d_model // n_head
    ks = jax.random.split(key, 10)

    def lin_init(kw, kb, fan_in, fan_out):
        bound = 1.0 / math.sqrt(fan_in)
        w = jax.random.uniform(kw, (fan_in, fan_out), jnp.float32, -bound, bound)
        b = jax.random.uniform(kb, (fan_out,), jnp.float32, -bound, bound)
        return w, b

    in_w, in_b = lin_init(ks[0], ks[1], embed_size, d_model)
    qv_bound = 1.0 / math.sqrt(d_model)
    qv_w = jax.random.uniform(ks[2], (d_model, 2 * d_model), jnp.float32,
                              -qv_bound, qv_bound)                       # no bias
    ffn_w, ffn_b = lin_init(ks[3], ks[4], d_model, d_model)
    out_w, out_b = lin_init(ks[5], ks[6], d_model, tag_size)

    xavier_std = math.sqrt(2.0 / (n_head + hd))
    r_r_bias = jax.random.normal(ks[7], (n_head, hd), jnp.float32) * xavier_std
    r_w_bias = jax.random.normal(ks[8], (n_head, hd), jnp.float32) * xavier_std

    pos_w, origin_shift = rel_sinusoidal_weights(1200, hd, 0)

    return dict(
        in_fc_w=in_w, in_fc_b=in_b,
        qv_w=qv_w,
        ffn_w=ffn_w, ffn_b=ffn_b,
        out_w=out_w, out_b=out_b,
        ln1_g=jnp.ones((d_model,), jnp.float32), ln1_b=jnp.zeros((d_model,), jnp.float32),
        ln2_g=jnp.ones((d_model,), jnp.float32), ln2_b=jnp.zeros((d_model,), jnp.float32),
        r_r_bias=r_r_bias, r_w_bias=r_w_bias,
        pos_weights=pos_w, origin_shift=origin_shift,
    )


# ----------------------------- TENER forward -----------------------------

def tener_forward(params, chars, mask, *, n_head, scale=1.0):
    B, L, E_in = chars.shape
    d_model = params["in_fc_w"].shape[1]
    hd = d_model // n_head
    tag_size = params["out_w"].shape[1]

    # in_fc
    x2d = linear(chars.reshape(B * L, E_in), params["in_fc_w"], params["in_fc_b"])
    x = x2d.reshape(B, L, d_model)

    # ---- TransformerLayer (num_layers=1): relative multi-head self-attention ----
    # qv projection (no bias in the torch module)
    qv = linear(x2d, params["qv_w"])                                  # (B*L, 2*d_model)
    q = qv[:, :d_model].reshape(B, L, d_model)
    v = qv[:, d_model:].reshape(B, L, d_model)

    # Relative sinusoidal position rows for offsets -L .. L-1 (exactly as the torch
    # RelativeEmbedding does), zero-padded on the row axis to a lane-friendly multiple
    # of 128 for the in-kernel BD matmul + strided-roll shift.
    positions = jnp.arange(-L, L) + params["origin_shift"]
    pos_embed = params["pos_weights"][positions]                      # (2L, hd)
    P = ((2 * L + 127) // 128) * 128
    pos_padded = jnp.zeros((P, hd), jnp.float32).at[:2 * L].set(pos_embed)

    maskf = mask.astype(jnp.float32).reshape(B, 1, L)

    # attention (residual add fused into the kernel)
    x = rel_attention(x, q, v, pos_padded, params["r_r_bias"], params["r_w_bias"],
                      maskf, n_head=n_head, scale=scale)
    x2d = layernorm(x.reshape(B * L, d_model), params["ln1_g"], params["ln1_b"])

    # FFN (linear + ReLU) with the residual add fused into the same kernel
    x2d = linear(x2d, params["ffn_w"], params["ffn_b"], relu=True,
                 add_input_residual=True)
    x2d = layernorm(x2d, params["ln2_g"], params["ln2_b"])

    # fc_dropout is identity at inference; out_fc with lane-padded output
    n_pad = ((tag_size + 127) // 128) * 128
    out_w = jnp.zeros((d_model, n_pad), jnp.float32).at[:, :tag_size].set(params["out_w"])
    out_b = jnp.zeros((n_pad,), jnp.float32).at[:tag_size].set(params["out_b"])
    logits = linear(x2d, out_w, out_b)[:, :tag_size]
    return logits.reshape(B, L, tag_size)


# ----------------------------- main -----------------------------

if __name__ == "__main__":
    B, L = 2, 8
    embed_size, d_model, n_head, tag_size = 16, 32, 4, 6

    key = jax.random.PRNGKey(0)
    k_param, k_chars = jax.random.split(key)
    params = init_params(k_param, embed_size, d_model, n_head, tag_size)

    chars = jax.random.normal(k_chars, (B, L, embed_size), jnp.float32)
    mask = jnp.array([[1, 1, 1, 1, 1, 1, 1, 1],
                      [1, 1, 1, 1, 1, 1, 0, 0]], dtype=jnp.int32)  # 0 = padding

    # scale=False in the module -> divide by 1.0
    fwd = jax.jit(functools.partial(tener_forward, n_head=n_head, scale=1.0))
    logits = fwd(params, chars, mask)
    logits = jax.block_until_ready(logits)

    assert logits.shape == (B, L, tag_size)
    assert bool(jnp.all(jnp.isfinite(logits)))
    print("KERNEL_OK")
</pallas_src>

<mosaic_0001>
module attributes {stable_mosaic.version = 11 : i64} {
  func.func @_linear_kernel(%arg0: i32, %arg1: memref<16x32xf32, #tpu.memory_space<vmem>>, %arg2: memref<32x64xf32, #tpu.memory_space<vmem>>, %arg3: memref<16x64xf32, #tpu.memory_space<vmem>>) attributes {dimension_semantics = [#tpu.dimension_semantics<parallel>], iteration_bounds = array<i64: 1>, scalar_prefetch = 0 : i64, scratch_operands = 0 : i64, tpu.core_type = #tpu.core_type<tc>, window_params = [{transform_indices = @transform_0, window_bounds = array<i64: 16, 32>}, {pipeline_mode = #tpu.pipeline_mode<synchronous>, transform_indices = @transform_1, window_bounds = array<i64: 32, 64>}, {transform_indices = @transform_2, window_bounds = array<i64: 16, 64>}]} {
    %c0 = arith.constant 0 : index
    %c0_0 = arith.constant 0 : index
    %0 = vector.load %arg1[%c0, %c0_0] : memref<16x32xf32, #tpu.memory_space<vmem>>, vector<16x32xf32>
    %c0_1 = arith.constant 0 : index
    %c0_2 = arith.constant 0 : index
    %1 = vector.load %arg2[%c0_1, %c0_2] : memref<32x64xf32, #tpu.memory_space<vmem>>, vector<32x64xf32>
    %cst = arith.constant dense<0.000000e+00> : vector<16x64xf32>
    %2 = tpu.matmul %0, %1, %cst {dimension_numbers = #tpu.dot_dimension_numbers<[1], [0], [0], [1], [0, 0, 1, 1], [], []>} : vector<16x32xf32>, vector<32x64xf32>, vector<16x64xf32> -> vector<16x64xf32>
    %c0_3 = arith.constant 0 : index
    %c0_4 = arith.constant 0 : index
    %3 = vector.load %arg3[%c0_3, %c0_4] : memref<16x64xf32, #tpu.memory_space<vmem>>, vector<16x64xf32>
    tpu.vector_store %arg3[%c0_3, %c0_4], %2 {strides = array<i32>} : memref<16x64xf32, #tpu.memory_space<vmem>>, vector<16x64xf32>,
    return
  }
  func.func @transform_0(%arg0: i32) -> (i32, i32) {
    %c0_i32 = arith.constant 0 : i32
    %c0_i32_0 = arith.constant 0 : i32
    return %arg0, %c0_i32 : i32, i32
  }
  func.func @transform_1(%arg0: i32) -> (i32, i32) {
    %c0_i32 = arith.constant 0 : i32
    %c0_i32_0 = arith.constant 0 : i32
    %c0_i32_1 = arith.constant 0 : i32
    return %c0_i32, %c0_i32_0 : i32, i32
  }
  func.func @transform_2(%arg0: i32) -> (i32, i32) {
    %c0_i32 = arith.constant 0 : i32
    %c0_i32_0 = arith.constant 0 : i32
    return %arg0, %c0_i32 : i32, i32
  }
}

module attributes {stable_mosaic.version = 11 : i64} {
  func.func @_linear_kernel(%arg0: i32, %arg1: memref<16x16xf32, #tpu.memory_space<vmem>>, %arg2: memref<16x32xf32, #tpu.memory_space<vmem>>, %arg3: memref<1x32xf32, #tpu.memory_space<vmem>>, %arg4: memref<16x32xf32, #tpu.memory_space<vmem>>) attributes {dimension_semantics = [#tpu.dimension_semantics<parallel>], iteration_bounds = array<i64: 1>, scalar_prefetch = 0 : i64, scratch_operands = 0 : i64, tpu.core_type = #tpu.core_type<tc>, window_params = [{transform_indices = @transform_0, window_bounds = array<i64: 16, 16>}, {pipeline_mode = #tpu.pipeline_mode<synchronous>, transform_indices = @transform_1, window_bounds = array<i64: 16, 32>}, {pipeline_mode = #tpu.pipeline_mode<synchronous>, transform_indices = @transform_2, window_bounds = array<i64: 1, 32>}, {transform_indices = @transform_3, window_bounds = array<i64: 16, 32>}]} {
    %c0 = arith.constant 0 : index
    %c0_0 = arith.constant 0 : index
    %0 = vector.load %arg1[%c0, %c0_0] : memref<16x16xf32, #tpu.memory_space<vmem>>, vector<16x16xf32>
    %c0_1 = arith.constant 0 : index
    %c0_2 = arith.constant 0 : index
    %1 = vector.load %arg2[%c0_1, %c0_2] : memref<16x32xf32, #tpu.memory_space<vmem>>, vector<16x32xf32>
    %cst = arith.constant dense<0.000000e+00> : vector<16x32xf32>
    %2 = tpu.matmul %0, %1, %cst {dimension_numbers = #tpu.dot_dimension_numbers<[1], [0], [0], [1], [0, 0, 1, 1], [], []>} : vector<16x16xf32>, vector<16x32xf32>, vector<16x32xf32> -> vector<16x32xf32>
    %c0_3 = arith.constant 0 : index
    %c0_4 = arith.constant 0 : index
    %3 = vector.load %arg3[%c0_3, %c0_4] : memref<1x32xf32, #tpu.memory_space<vmem>>, vector<1x32xf32>
    %4 = vector.broadcast %3 : vector<1x32xf32> to vector<16x32xf32>
    %5 = arith.addf %2, %4 : vector<16x32xf32>
    %c0_5 = arith.constant 0 : index
    %c0_6 = arith.constant 0 : index
    %6 = vector.load %arg4[%c0_5, %c0_6] : memref<16x32xf32, #tpu.memory_space<vmem>>, vector<16x32xf32>
    tpu.vector_store %arg4[%c0_5, %c0_6], %5 {strides = array<i32>} : memref<16x32xf32, #tpu.memory_space<vmem>>, vector<16x32xf32>,
    return
  }
  func.func @transform_0(%arg0: i32) -> (i32, i32) {
    %c0_i32 = arith.constant 0 : i32
    %c0_i32_0 = arith.constant 0 : i32
    return %arg0, %c0_i32 : i32, i32
  }
  func.func @transform_1(%arg0: i32) -> (i32, i32) {
    %c0_i32 = arith.constant 0 : i32
    %c0_i32_0 = arith.constant 0 : i32
    %c0_i32_1 = arith.constant 0 : i32
    return %c0_i32, %c0_i32_0 : i32, i32
  }
  func.func @transform_2(%arg0: i32) -> (i32, i32) {
    %c0_i32 = arith.constant 0 : i32
    %c0_i32_0 = arith.constant 0 : i32
    %c0_i32_1 = arith.constant 0 : i32
    return %c0_i32, %c0_i32_0 : i32, i32
  }
  func.func @transform_3(%arg0: i32) -> (i32, i32) {
    %c0_i32 = arith.constant 0 : i32
    %c0_i32_0 = arith.constant 0 : i32
    return %arg0, %c0_i32 : i32, i32
  }
}

module attributes {stable_mosaic.version = 11 : i64} {
  func.func @_rel_attn_kernel(%arg0: i32, %arg1: memref<1x8x32xf32, #tpu.memory_space<vmem>>, %arg2: memref<1x8x32xf32, #tpu.memory_space<vmem>>, %arg3: memref<1x8x32xf32, #tpu.memory_space<vmem>>, %arg4: memref<128x8xf32, #tpu.memory_space<vmem>>, %arg5: memref<4x8xf32, #tpu.memory_space<vmem>>, %arg6: memref<4x8xf32, #tpu.memory_space<vmem>>, %arg7: memref<1x1x8xf32, #tpu.memory_space<vmem>>, %arg8: memref<1x8x32xf32, #tpu.memory_space<vmem>>) attributes {dimension_semantics = [#tpu.dimension_semantics<parallel>], iteration_bounds = array<i64: 2>, scalar_prefetch = 0 : i64, scratch_operands = 0 : i64, tpu.core_type = #tpu.core_type<tc>, window_params = [{transform_indices = @transform_0, window_bounds = array<i64: 1, 8, 32>}, {transform_indices = @transform_1, window_bounds = array<i64: 1, 8, 32>}, {transform_indices = @transform_2, window_bounds = array<i64: 1, 8, 32>}, {pipeline_mode = #tpu.pipeline_mode<synchronous>, transform_indices = @transform_3, window_bounds = array<i64: 128, 8>}, {pipeline_mode = #tpu.pipeline_mode<synchronous>, transform_indices = @transform_4, window_bounds = array<i64: 4, 8>}, {pipeline_mode = #tpu.pipeline_mode<synchronous>, transform_indices = @transform_5, window_bounds = array<i64: 4, 8>}, {transform_indices = @transform_6, window_bounds = array<i64: 1, 1, 8>}, {transform_indices = @transform_7, window_bounds = array<i64: 1, 8, 32>}]} {
    %c0 = arith.constant 0 : index
    %c0_0 = arith.constant 0 : index
    %c0_1 = arith.constant 0 : index
    %0 = vector.load %arg1[%c0, %c0_0, %c0_1] : memref<1x8x32xf32, #tpu.memory_space<vmem>>, vector<1x8x32xf32>
    %1 = vector.shape_cast %0 : vector<1x8x32xf32> to vector<8x32xf32>
    %c0_2 = arith.constant 0 : index
    %c0_3 = arith.constant 0 : index
    %c0_4 = arith.constant 0 : index
    %2 = vector.load %arg2[%c0_2, %c0_3, %c0_4] : memref<1x8x32xf32, #tpu.memory_space<vmem>>, vector<1x8x32xf32>
    %3 = vector.shape_cast %2 : vector<1x8x32xf32> to vector<8x32xf32>
    %c0_5 = arith.constant 0 : index
    %c0_6 = arith.constant 0 : index
    %c0_7 = arith.constant 0 : index
    %4 = vector.load %arg3[%c0_5, %c0_6, %c0_7] : memref<1x8x32xf32, #tpu.memory_space<vmem>>, vector<1x8x32xf32>
    %5 = vector.shape_cast %4 : vector<1x8x32xf32> to vector<8x32xf32>
    %c0_8 = arith.constant 0 : index
    %c0_9 = arith.constant 0 : index
    %6 = vector.load %arg4[%c0_8, %c0_9] : memref<128x8xf32, #tpu.memory_space<vmem>>, vector<128x8xf32>
    %c0_10 = arith.constant 0 : index
    %c0_11 = arith.constant 0 : index
    %c0_12 = arith.constant 0 : index
    %7 = vector.load %arg7[%c0_10, %c0_11, %c0_12] : memref<1x1x8xf32, #tpu.memory_space<vmem>>, vector<1x1x8xf32>
    %8 = vector.shape_cast %7 : vector<1x1x8xf32> to vector<1x8xf32>
    %9 = vector.extract_strided_slice %3 {offsets = [0, 0], sizes = [8, 8], strides = [1, 1]} : vector<8x32xf32> to vector<8x8xf32>
    %10 = vector.extract_strided_slice %1 {offsets = [0, 0], sizes = [8, 8], strides = [1, 1]} : vector<8x32xf32> to vector<8x8xf32>
    %11 = vector.extract_strided_slice %5 {offsets = [0, 0], sizes = [8, 8], strides = [1, 1]} : vector<8x32xf32> to vector<8x8xf32>
    %c0_13 = arith.constant 0 : index
    %c0_14 = arith.constant 0 : index
    %12 = vector.load %arg5[%c0_13, %c0_14] : memref<4x8xf32, #tpu.memory_space<vmem>>, vector<1x8xf32>
    %c0_15 = arith.constant 0 : index
    %c0_16 = arith.constant 0 : index
    %13 = vector.load %arg6[%c0_15, %c0_16] : memref<4x8xf32, #tpu.memory_space<vmem>>, vector<1x8xf32>
    %14 = vector.broadcast %12 : vector<1x8xf32> to vector<8x8xf32>
    %15 = arith.addf %9, %14 : vector<8x8xf32>
    %cst = arith.constant dense<0.000000e+00> : vector<8x8xf32>
    %16 = tpu.matmul %15, %10, %cst {dimension_numbers = #tpu.dot_dimension_numbers<[1], [1], [0], [0], [0, 0, 1, 0], [], []>} : vector<8x8xf32>, vector<8x8xf32>, vector<8x8xf32> -> vector<8x8xf32>
    %17 = vector.broadcast %13 : vector<1x8xf32> to vector<8x8xf32>
    %18 = arith.addf %9, %17 : vector<8x8xf32>
    %cst_17 = arith.constant dense<0.000000e+00> : vector<8x128xf32>
    %19 = tpu.matmul %18, %6, %cst_17 {dimension_numbers = #tpu.dot_dimension_numbers<[1], [1], [0], [0], [0, 0, 1, 0], [], []>} : vector<8x8xf32>, vector<128x8xf32>, vector<8x128xf32> -> vector<8x128xf32>
    %c120_i32 = arith.constant 120 : i32
    %20 = tpu.dynamic_rotate %19 by %c120_i32 dim 1 {stride = 1 : si32, stride_dimension = 0 : si32} : vector<8x128xf32>, i32 -> vector<8x128xf32>
    %21 = vector.extract_strided_slice %20 {offsets = [0, 0], sizes = [8, 8], strides = [1, 1]} : vector<8x128xf32> to vector<8x8xf32>
    %22 = arith.addf %16, %21 : vector<8x8xf32>
    %cst_18 = arith.constant 0.000000e+00 : f32
    %23 = vector.broadcast %cst_18 : f32 to vector<1x8xf32>
    %24 = arith.cmpf oeq, %8, %23 : vector<1x8xf32>
    %cst_19 = arith.constant -1.000000e+30 : f32
    %25 = vector.shape_cast %24 : vector<1x8xi1> to vector<1x8xi1>
    %26 = vector.broadcast %25 : vector<1x8xi1> to vector<8x8xi1>
    %27 = vector.broadcast %cst_19 : f32 to vector<8x8xf32>
    %28 = arith.select %26, %27, %22 : vector<8x8xi1>, vector<8x8xf32>
    %cst_20 = arith.constant dense<0xFF800000> : vector<8xf32>
    %29 = vector.multi_reduction <maximumf>, %28, %cst_20 [1] : vector<8x8xf32> to vector<8xf32>
    %30 = vector.shape_cast %29 : vector<8xf32> to vector<8x1xf32>
    %31 = vector.broadcast %30 : vector<8x1xf32> to vector<8x8xf32>
    %32 = arith.subf %28, %31 : vector<8x8xf32>
    %33 = math.exp %32 : vector<8x8xf32>
    %cst_21 = arith.constant dense<0.000000e+00> : vector<8xf32>
    %34 = vector.multi_reduction <add>, %33, %cst_21 [1] : vector<8x8xf32> to vector<8xf32>
    %35 = vector.shape_cast %34 : vector<8xf32> to vector<8x1xf32>
    %36 = tpu.reciprocal %35 {approx = true} : vector<8x1xf32> -> vector<8x1xf32>
    %37 = vector.broadcast %36 : vector<8x1xf32> to vector<8x8xf32>
    %38 = arith.mulf %33, %37 : vector<8x8xf32>
    %cst_22 = arith.constant dense<0.000000e+00> : vector<8x8xf32>
    %39 = tpu.matmul %38, %11, %cst_22 {dimension_numbers = #tpu.dot_dimension_numbers<[1], [0], [0], [1], [0, 0, 1, 1], [], []>} : vector<8x8xf32>, vector<8x8xf32>, vector<8x8xf32> -> vector<8x8xf32>
    %40 = vector.extract_strided_slice %3 {offsets = [0, 8], sizes = [8, 8], strides = [1, 1]} : vector<8x32xf32> to vector<8x8xf32>
    %41 = vector.extract_strided_slice %1 {offsets = [0, 8], sizes = [8, 8], strides = [1, 1]} : vector<8x32xf32> to vector<8x8xf32>
    %42 = vector.extract_strided_slice %5 {offsets = [0, 8], sizes = [8, 8], strides = [1, 1]} : vector<8x32xf32> to vector<8x8xf32>
    %c1 = arith.constant 1 : index
    %c0_23 = arith.constant 0 : index
    %43 = vector.load %arg5[%c1, %c0_23] : memref<4x8xf32, #tpu.memory_space<vmem>>, vector<1x8xf32>
    %c1_24 = arith.constant 1 : index
    %c0_25 = arith.constant 0 : index
    %44 = vector.load %arg6[%c1_24, %c0_25] : memref<4x8xf32, #tpu.memory_space<vmem>>, vector<1x8xf32>
    %45 = vector.broadcast %43 : vector<1x8xf32> to vector<8x8xf32>
    %46 = arith.addf %40, %45 : vector<8x8xf32>
    %cst_26 = arith.constant dense<0.000000e+00> : vector<8x8xf32>
    %47 = tpu.matmul %46, %41, %cst_26 {dimension_numbers = #tpu.dot_dimension_numbers<[1], [1], [0], [0], [0, 0, 1, 0], [], []>} : vector<8x8xf32>, vector<8x8xf32>, vector<8x8xf32> -> vector<8x8xf32>
    %48 = vector.broadcast %44 : vector<1x8xf32> to vector<8x8xf32>
    %49 = arith.addf %40, %48 : vector<8x8xf32>
    %cst_27 = arith.constant dense<0.000000e+00> : vector<8x128xf32>
    %50 = tpu.matmul %49, %6, %cst_27 {dimension_numbers = #tpu.dot_dimension_numbers<[1], [1], [0], [0], [0, 0, 1, 0], [], []>} : vector<8x8xf32>, vector<128x8xf32>, vector<8x128xf32> -> vector<8x128xf32>
    %c120_i32_28 = arith.constant 120 : i32
    %51 = tpu.dynamic_rotate %50 by %c120_i32_28 dim 1 {stride = 1 : si32, stride_dimension = 0 : si32} : vector<8x128xf32>, i32 -> vector<8x128xf32>
    %52 = vector.extract_strided_slice %51 {offsets = [0, 0], sizes = [8, 8], strides = [1, 1]} : vector<8x128xf32> to vector<8x8xf32>
    %53 = arith.addf %47, %52 : vector<8x8xf32>
    %cst_29 = arith.constant 0.000000e+00 : f32
    %54 = vector.broadcast %cst_29 : f32 to vector<1x8xf32>
    %55 = arith.cmpf oeq, %8, %54 : vector<1x8xf32>
    %cst_30 = arith.constant -1.000000e+30 : f32
    %56 = vector.shape_cast %55 : vector<1x8xi1> to vector<1x8xi1>
    %57 = vector.broadcast %56 : vector<1x8xi1> to vector<8x8xi1>
    %58 = vector.broadcast %cst_30 : f32 to vector<8x8xf32>
    %59 = arith.select %57, %58, %53 : vector<8x8xi1>, vector<8x8xf32>
    %cst_31 = arith.constant dense<0xFF800000> : vector<8xf32>
    %60 = vector.multi_reduction <maximumf>, %59, %cst_31 [1] : vector<8x8xf32> to vector<8xf32>
    %61 = vector.shape_cast %60 : vector<8xf32> to vector<8x1xf32>
    %62 = vector.broadcast %61 : vector<8x1xf32> to vector<8x8xf32>
    %63 = arith.subf %59, %62 : vector<8x8xf32>
    %64 = math.exp %63 : vector<8x8xf32>
    %cst_32 = arith.constant dense<0.000000e+00> : vector<8xf32>
    %65 = vector.multi_reduction <add>, %64, %cst_32 [1] : vector<8x8xf32> to vector<8xf32>
    %66 = vector.shape_cast %65 : vector<8xf32> to vector<8x1xf32>
    %67 = tpu.reciprocal %66 {approx = true} : vector<8x1xf32> -> vector<8x1xf32>
    %68 = vector.broadcast %67 : vector<8x1xf32> to vector<8x8xf32>
    %69 = arith.mulf %64, %68 : vector<8x8xf32>
    %cst_33 = arith.constant dense<0.000000e+00> : vector<8x8xf32>
    %70 = tpu.matmul %69, %42, %cst_33 {dimension_numbers = #tpu.dot_dimension_numbers<[1], [0], [0], [1], [0, 0, 1, 1], [], []>} : vector<8x8xf32>, vector<8x8xf32>, vector<8x8xf32> -> vector<8x8xf32>
    %71 = vector.extract_strided_slice %3 {offsets = [0, 16], sizes = [8, 8], strides = [1, 1]} : vector<8x32xf32> to vector<8x8xf32>
    %72 = vector.extract_strided_slice %1 {offsets = [0, 16], sizes = [8, 8], strides = [1, 1]} : vector<8x32xf32> to vector<8x8xf32>
    %73 = vector.extract_strided_slice %5 {offsets = [0, 16], sizes = [8, 8], strides = [1, 1]} : vector<8x32xf32> to vector<8x8xf32>
    %c2 = arith.constant 2 : index
    %c0_34 = arith.constant 0 : index
    %74 = vector.load %arg5[%c2, %c0_34] : memref<4x8xf32, #tpu.memory_space<vmem>>, vector<1x8xf32>
    %c2_35 = arith.constant 2 : index
    %c0_36 = arith.constant 0 : index
    %75 = vector.load %arg6[%c2_35, %c0_36] : memref<4x8xf32, #tpu.memory_space<vmem>>, vector<1x8xf32>
    %76 = vector.broadcast %74 : vector<1x8xf32> to vector<8x8xf32>
    %77 = arith.addf %71, %76 : vector<8x8xf32>
    %cst_37 = arith.constant dense<0.000000e+00> : vector<8x8xf32>
    %78 = tpu.matmul %77, %72, %cst_37 {dimension_numbers = #tpu.dot_dimension_numbers<[1], [1], [0], [0], [0, 0, 1, 0], [], []>} : vector<8x8xf32>, vector<8x8xf32>, vector<8x8xf32> -> vector<8x8xf32>
    %79 = vector.broadcast %75 : vector<1x8xf32> to vector<8x8xf32>
    %80 = arith.addf %71, %79 : vector<8x8xf32>
    %cst_38 = arith.constant dense<0.000000e+00> : vector<8x128xf32>
    %81 = tpu.matmul %80, %6, %cst_38 {dimension_numbers = #tpu.dot_dimension_numbers<[1], [1], [0], [0], [0, 0, 1, 0], [], []>} : vector<8x8xf32>, vector<128x8xf32>, vector<8x128xf32> -> vector<8x128xf32>
    %c120_i32_39 = arith.constant 120 : i32
    %82 = tpu.dynamic_rotate %81 by %c120_i32_39 dim 1 {stride = 1 : si32, stride_dimension = 0 : si32} : vector<8x128xf32>, i32 -> vector<8x128xf32>
    %83 = vector.extract_strided_slice %82 {offsets = [0, 0], sizes = [8, 8], strides = [1, 1]} : vector<8x128xf32> to vector<8x8xf32>
    %84 = arith.addf %78, %83 : vector<8x8xf32>
    %cst_40 = arith.constant 0.000000e+00 : f32
    %85 = vector.broadcast %cst_40 : f32 to vector<1x8xf32>
    %86 = arith.cmpf oeq, %8, %85 : vector<1x8xf32>
    %cst_41 = arith.constant -1.000000e+30 : f32
    %87 = vector.shape_cast %86 : vector<1x8xi1> to vector<1x8xi1>
    %88 = vector.broadcast %87 : vector<1x8xi1> to vector<8x8xi1>
    %89 = vector.broadcast %cst_41 : f32 to vector<8x8xf32>
    %90 = arith.select %88, %89, %84 : vector<8x8xi1>, vector<8x8xf32>
    %cst_42 = arith.constant dense<0xFF800000> : vector<8xf32>
    %91 = vector.multi_reduction <maximumf>, %90, %cst_42 [1] : vector<8x8xf32> to vector<8xf32>
    %92 = vector.shape_cast %91 : vector<8xf32> to vector<8x1xf32>
    %93 = vector.broadcast %92 : vector<8x1xf32> to vector<8x8xf32>
    %94 = arith.subf %90, %93 : vector<8x8xf32>
    %95 = math.exp %94 : vector<8x8xf32>
    %cst_43 = arith.constant dense<0.000000e+00> : vector<8xf32>
    %96 = vector.multi_reduction <add>, %95, %cst_43 [1] : vector<8x8xf32> to vector<8xf32>
    %97 = vector.shape_cast %96 : vector<8xf32> to vector<8x1xf32>
    %98 = tpu.reciprocal %97 {approx = true} : vector<8x1xf32> -> vector<8x1xf32>
    %99 = vector.broadcast %98 : vector<8x1xf32> to vector<8x8xf32>
    %100 = arith.mulf %95, %99 : vector<8x8xf32>
    %cst_44 = arith.constant dense<0.000000e+00> : vector<8x8xf32>
    %101 = tpu.matmul %100, %73, %cst_44 {dimension_numbers = #tpu.dot_dimension_numbers<[1], [0], [0], [1], [0, 0, 1, 1], [], []>} : vector<8x8xf32>, vector<8x8xf32>, vector<8x8xf32> -> vector<8x8xf32>
    %102 = vector.extract_strided_slice %3 {offsets = [0, 24], sizes = [8, 8], strides = [1, 1]} : vector<8x32xf32> to vector<8x8xf32>
    %103 = vector.extract_strided_slice %1 {offsets = [0, 24], sizes = [8, 8], strides = [1, 1]} : vector<8x32xf32> to vector<8x8xf32>
    %104 = vector.extract_strided_slice %5 {offsets = [0, 24], sizes = [8, 8], strides = [1, 1]} : vector<8x32xf32> to vector<8x8xf32>
    %c3 = arith.constant 3 : index
    %c0_45 = arith.constant 0 : index
    %105 = vector.load %arg5[%c3, %c0_45] : memref<4x8xf32, #tpu.memory_space<vmem>>, vector<1x8xf32>
    %c3_46 = arith.constant 3 : index
    %c0_47 = arith.constant 0 : index
    %106 = vector.load %arg6[%c3_46, %c0_47] : memref<4x8xf32, #tpu.memory_space<vmem>>, vector<1x8xf32>
    %107 = vector.broadcast %105 : vector<1x8xf32> to vector<8x8xf32>
    %108 = arith.addf %102, %107 : vector<8x8xf32>
    %cst_48 = arith.constant dense<0.000000e+00> : vector<8x8xf32>
    %109 = tpu.matmul %108, %103, %cst_48 {dimension_numbers = #tpu.dot_dimension_numbers<[1], [1], [0], [0], [0, 0, 1, 0], [], []>} : vector<8x8xf32>, vector<8x8xf32>, vector<8x8xf32> -> vector<8x8xf32>
    %110 = vector.broadcast %106 : vector<1x8xf32> to vector<8x8xf32>
    %111 = arith.addf %102, %110 : vector<8x8xf32>
    %cst_49 = arith.constant dense<0.000000e+00> : vector<8x128xf32>
    %112 = tpu.matmul %111, %6, %cst_49 {dimension_numbers = #tpu.dot_dimension_numbers<[1], [1], [0], [0], [0, 0, 1, 0], [], []>} : vector<8x8xf32>, vector<128x8xf32>, vector<8x128xf32> -> vector<8x128xf32>
    %c120_i32_50 = arith.constant 120 : i32
    %113 = tpu.dynamic_rotate %112 by %c120_i32_50 dim 1 {stride = 1 : si32, stride_dimension = 0 : si32} : vector<8x128xf32>, i32 -> vector<8x128xf32>
    %114 = vector.extract_strided_slice %113 {offsets = [0, 0], sizes = [8, 8], strides = [1, 1]} : vector<8x128xf32> to vector<8x8xf32>
    %115 = arith.addf %109, %114 : vector<8x8xf32>
    %cst_51 = arith.constant 0.000000e+00 : f32
    %116 = vector.broadcast %cst_51 : f32 to vector<1x8xf32>
    %117 = arith.cmpf oeq, %8, %116 : vector<1x8xf32>
    %cst_52 = arith.constant -1.000000e+30 : f32
    %118 = vector.shape_cast %117 : vector<1x8xi1> to vector<1x8xi1>
    %119 = vector.broadcast %118 : vector<1x8xi1> to vector<8x8xi1>
    %120 = vector.broadcast %cst_52 : f32 to vector<8x8xf32>
    %121 = arith.select %119, %120, %115 : vector<8x8xi1>, vector<8x8xf32>
    %cst_53 = arith.constant dense<0xFF800000> : vector<8xf32>
    %122 = vector.multi_reduction <maximumf>, %121, %cst_53 [1] : vector<8x8xf32> to vector<8xf32>
    %123 = vector.shape_cast %122 : vector<8xf32> to vector<8x1xf32>
    %124 = vector.broadcast %123 : vector<8x1xf32> to vector<8x8xf32>
    %125 = arith.subf %121, %124 : vector<8x8xf32>
    %126 = math.exp %125 : vector<8x8xf32>
    %cst_54 = arith.constant dense<0.000000e+00> : vector<8xf32>
    %127 = vector.multi_reduction <add>, %126, %cst_54 [1] : vector<8x8xf32> to vector<8xf32>
    %128 = vector.shape_cast %127 : vector<8xf32> to vector<8x1xf32>
    %129 = tpu.reciprocal %128 {approx = true} : vector<8x1xf32> -> vector<8x1xf32>
    %130 = vector.broadcast %129 : vector<8x1xf32> to vector<8x8xf32>
    %131 = arith.mulf %126, %130 : vector<8x8xf32>
    %cst_55 = arith.constant dense<0.000000e+00> : vector<8x8xf32>
    %132 = tpu.matmul %131, %104, %cst_55 {dimension_numbers = #tpu.dot_dimension_numbers<[1], [0], [0], [1], [0, 0, 1, 1], [], []>} : vector<8x8xf32>, vector<8x8xf32>, vector<8x8xf32> -> vector<8x8xf32>
    %133 = tpu.concatenate %39, %70, %101, %132 in 1 : vector<8x8xf32>, vector<8x8xf32>, vector<8x8xf32>, vector<8x8xf32> -> vector<8x32xf32>
    %134 = arith.addf %133, %1 : vector<8x32xf32>
    %c0_56 = arith.constant 0 : index
    %c0_57 = arith.constant 0 : index
    %c0_58 = arith.constant 0 : index
    %135 = vector.load %arg8[%c0_56, %c0_57, %c0_58] : memref<1x8x32xf32, #tpu.memory_space<vmem>>, vector<1x8x32xf32>
    %136 = vector.shape_cast %135 : vector<1x8x32xf32> to vector<8x32xf32>
    %137 = vector.shape_cast %134 : vector<8x32xf32> to vector<1x8x32xf32>
    tpu.vector_store %arg8[%c0_56, %c0_57, %c0_58], %137 {strides = array<i32>} : memref<1x8x32xf32, #tpu.memory_space<vmem>>, vector<1x8x32xf32>,
    return
  }
  func.func @transform_0(%arg0: i32) -> (i32, i32, i32) {
    %c0_i32 = arith.constant 0 : i32
    %c0_i32_0 = arith.constant 0 : i32
    %c0_i32_1 = arith.constant 0 : i32
    return %arg0, %c0_i32, %c0_i32_0 : i32, i32, i32
  }
  func.func @transform_1(%arg0: i32) -> (i32, i32, i32) {
    %c0_i32 = arith.constant 0 : i32
    %c0_i32_0 = arith.constant 0 : i32
    %c0_i32_1 = arith.constant 0 : i32
    return %arg0, %c0_i32, %c0_i32_0 : i32, i32, i32
  }
  func.func @transform_2(%arg0: i32) -> (i32, i32, i32) {
    %c0_i32 = arith.constant 0 : i32
    %c0_i32_0 = arith.constant 0 : i32
    %c0_i32_1 = arith.constant 0 : i32
    return %arg0, %c0_i32, %c0_i32_0 : i32, i32, i32
  }
  func.func @transform_3(%arg0: i32) -> (i32, i32) {
    %c0_i32 = arith.constant 0 : i32
    %c0_i32_0 = arith.constant 0 : i32
    %c0_i32_1 = arith.constant 0 : i32
    return %c0_i32, %c0_i32_0 : i32, i32
  }
  func.func @transform_4(%arg0: i32) -> (i32, i32) {
    %c0_i32 = arith.constant 0 : i32
    %c0_i32_0 = arith.constant 0 : i32
    %c0_i32_1 = arith.constant 0 : i32
    return %c0_i32, %c0_i32_0 : i32, i32
  }
  func.func @transform_5(%arg0: i32) -> (i32, i32) {
    %c0_i32 = arith.constant 0 : i32
    %c0_i32_0 = arith.constant 0 : i32
    %c0_i32_1 = arith.constant 0 : i32
    return %c0_i32, %c0_i32_0 : i32, i32
  }
  func.func @transform_6(%arg0: i32) -> (i32, i32, i32) {
    %c0_i32 = arith.constant 0 : i32
    %c0_i32_0 = arith.constant 0 : i32
    %c0_i32_1 = arith.constant 0 : i32
    return %arg0, %c0_i32, %c0_i32_0 : i32, i32, i32
  }
  func.func @transform_7(%arg0: i32) -> (i32, i32, i32) {
    %c0_i32 = arith.constant 0 : i32
    %c0_i32_0 = arith.constant 0 : i32
    %c0_i32_1 = arith.constant 0 : i32
    return %arg0, %c0_i32, %c0_i32_0 : i32, i32, i32
  }
}

module attributes {stable_mosaic.version = 11 : i64} {
  func.func @_linear_kernel(%arg0: i32, %arg1: memref<16x32xf32, #tpu.memory_space<vmem>>, %arg2: memref<32x32xf32, #tpu.memory_space<vmem>>, %arg3: memref<1x32xf32, #tpu.memory_space<vmem>>, %arg4: memref<16x32xf32, #tpu.memory_space<vmem>>) attributes {dimension_semantics = [#tpu.dimension_semantics<parallel>], iteration_bounds = array<i64: 1>, scalar_prefetch = 0 : i64, scratch_operands = 0 : i64, tpu.core_type = #tpu.core_type<tc>, window_params = [{transform_indices = @transform_0, window_bounds = array<i64: 16, 32>}, {pipeline_mode = #tpu.pipeline_mode<synchronous>, transform_indices = @transform_1, window_bounds = array<i64: 32, 32>}, {pipeline_mode = #tpu.pipeline_mode<synchronous>, transform_indices = @transform_2, window_bounds = array<i64: 1, 32>}, {transform_indices = @transform_3, window_bounds = array<i64: 16, 32>}]} {
    %c0 = arith.constant 0 : index
    %c0_0 = arith.constant 0 : index
    %0 = vector.load %arg1[%c0, %c0_0] : memref<16x32xf32, #tpu.memory_space<vmem>>, vector<16x32xf32>
    %c0_1 = arith.constant 0 : index
    %c0_2 = arith.constant 0 : index
    %1 = vector.load %arg2[%c0_1, %c0_2] : memref<32x32xf32, #tpu.memory_space<vmem>>, vector<32x32xf32>
    %cst = arith.constant dense<0.000000e+00> : vector<16x32xf32>
    %2 = tpu.matmul %0, %1, %cst {dimension_numbers = #tpu.dot_dimension_numbers<[1], [0], [0], [1], [0, 0, 1, 1], [], []>} : vector<16x32xf32>, vector<32x32xf32>, vector<16x32xf32> -> vector<16x32xf32>
    %c0_3 = arith.constant 0 : index
    %c0_4 = arith.constant 0 : index
    %3 = vector.load %arg3[%c0_3, %c0_4] : memref<1x32xf32, #tpu.memory_space<vmem>>, vector<1x32xf32>
    %4 = vector.broadcast %3 : vector<1x32xf32> to vector<16x32xf32>
    %5 = arith.addf %2, %4 : vector<16x32xf32>
    %cst_5 = arith.constant 0.000000e+00 : f32
    %6 = vector.broadcast %cst_5 : f32 to vector<16x32xf32>
    %7 = arith.maximumf %5, %6 : vector<16x32xf32>
    %8 = arith.addf %7, %0 : vector<16x32xf32>
    %c0_6 = arith.constant 0 : index
    %c0_7 = arith.constant 0 : index
    %9 = vector.load %arg4[%c0_6, %c0_7] : memref<16x32xf32, #tpu.memory_space<vmem>>, vector<16x32xf32>
    tpu.vector_store %arg4[%c0_6, %c0_7], %8 {strides = array<i32>} : memref<16x32xf32, #tpu.memory_space<vmem>>, vector<16x32xf32>,
    return
  }
  func.func @transform_0(%arg0: i32) -> (i32, i32) {
    %c0_i32 = arith.constant 0 : i32
    %c0_i32_0 = arith.constant 0 : i32
    return %arg0, %c0_i32 : i32, i32
  }
  func.func @transform_1(%arg0: i32) -> (i32, i32) {
    %c0_i32 = arith.constant 0 : i32
    %c0_i32_0 = arith.constant 0 : i32
    %c0_i32_1 = arith.constant 0 : i32
    return %c0_i32, %c0_i32_0 : i32, i32
  }
  func.func @transform_2(%arg0: i32) -> (i32, i32) {
    %c0_i32 = arith.constant 0 : i32
    %c0_i32_0 = arith.constant 0 : i32
    %c0_i32_1 = arith.constant 0 : i32
    return %c0_i32, %c0_i32_0 : i32, i32
  }
  func.func @transform_3(%arg0: i32) -> (i32, i32) {
    %c0_i32 = arith.constant 0 : i32
    %c0_i32_0 = arith.constant 0 : i32
    return %arg0, %c0_i32 : i32, i32
  }
}

module attributes {stable_mosaic.version = 11 : i64} {
  func.func @_layernorm_kernel(%arg0: i32, %arg1: memref<16x32xf32, #tpu.memory_space<vmem>>, %arg2: memref<1x32xf32, #tpu.memory_space<vmem>>, %arg3: memref<1x32xf32, #tpu.memory_space<vmem>>, %arg4: memref<16x32xf32, #tpu.memory_space<vmem>>) attributes {dimension_semantics = [#tpu.dimension_semantics<parallel>], iteration_bounds = array<i64: 1>, scalar_prefetch = 0 : i64, scratch_operands = 0 : i64, tpu.core_type = #tpu.core_type<tc>, window_params = [{transform_indices = @transform_0, window_bounds = array<i64: 16, 32>}, {pipeline_mode = #tpu.pipeline_mode<synchronous>, transform_indices = @transform_1, window_bounds = array<i64: 1, 32>}, {pipeline_mode = #tpu.pipeline_mode<synchronous>, transform_indices = @transform_2, window_bounds = array<i64: 1, 32>}, {transform_indices = @transform_3, window_bounds = array<i64: 16, 32>}]} {
    %c0 = arith.constant 0 : index
    %c0_0 = arith.constant 0 : index
    %0 = vector.load %arg1[%c0, %c0_0] : memref<16x32xf32, #tpu.memory_space<vmem>>, vector<16x32xf32>
    %cst = arith.constant dense<0.000000e+00> : vector<16xf32>
    %1 = vector.multi_reduction <add>, %0, %cst [1] : vector<16x32xf32> to vector<16xf32>
    %2 = vector.shape_cast %1 : vector<16xf32> to vector<16x1xf32>
    %cst_1 = arith.constant 3.200000e+01 : f32
    %3 = vector.broadcast %cst_1 : f32 to vector<16x1xf32>
    %4 = arith.divf %2, %3 : vector<16x1xf32>
    %5 = vector.broadcast %4 : vector<16x1xf32> to vector<16x32xf32>
    %6 = arith.subf %0, %5 : vector<16x32xf32>
    %7 = arith.mulf %6, %6 : vector<16x32xf32>
    %cst_2 = arith.constant dense<0.000000e+00> : vector<16xf32>
    %8 = vector.multi_reduction <add>, %7, %cst_2 [1] : vector<16x32xf32> to vector<16xf32>
    %9 = vector.shape_cast %8 : vector<16xf32> to vector<16x1xf32>
    %cst_3 = arith.constant 3.200000e+01 : f32
    %10 = vector.broadcast %cst_3 : f32 to vector<16x1xf32>
    %11 = arith.divf %9, %10 : vector<16x1xf32>
    %cst_4 = arith.constant 9.99999974E-6 : f32
    %12 = vector.broadcast %cst_4 : f32 to vector<16x1xf32>
    %13 = arith.addf %11, %12 : vector<16x1xf32>
    %14 = math.rsqrt %13 : vector<16x1xf32>
    %15 = vector.broadcast %14 : vector<16x1xf32> to vector<16x32xf32>
    %16 = arith.mulf %6, %15 : vector<16x32xf32>
    %c0_5 = arith.constant 0 : index
    %c0_6 = arith.constant 0 : index
    %17 = vector.load %arg2[%c0_5, %c0_6] : memref<1x32xf32, #tpu.memory_space<vmem>>, vector<1x32xf32>
    %18 = vector.broadcast %17 : vector<1x32xf32> to vector<16x32xf32>
    %19 = arith.mulf %16, %18 : vector<16x32xf32>
    %c0_7 = arith.constant 0 : index
    %c0_8 = arith.constant 0 : index
    %20 = vector.load %arg3[%c0_7, %c0_8] : memref<1x32xf32, #tpu.memory_space<vmem>>, vector<1x32xf32>
    %21 = vector.broadcast %20 : vector<1x32xf32> to vector<16x32xf32>
    %22 = arith.addf %19, %21 : vector<16x32xf32>
    %c0_9 = arith.constant 0 : index
    %c0_10 = arith.constant 0 : index
    %23 = vector.load %arg4[%c0_9, %c0_10] : memref<16x32xf32, #tpu.memory_space<vmem>>, vector<16x32xf32>
    tpu.vector_store %arg4[%c0_9, %c0_10], %22 {strides = array<i32>} : memref<16x32xf32, #tpu.memory_space<vmem>>, vector<16x32xf32>,
    return
  }
  func.func @transform_0(%arg0: i32) -> (i32, i32) {
    %c0_i32 = arith.constant 0 : i32
    %c0_i32_0 = arith.constant 0 : i32
    return %arg0, %c0_i32 : i32, i32
  }
  func.func @transform_1(%arg0: i32) -> (i32, i32) {
    %c0_i32 = arith.constant 0 : i32
    %c0_i32_0 = arith.constant 0 : i32
    %c0_i32_1 = arith.constant 0 : i32
    return %c0_i32, %c0_i32_0 : i32, i32
  }
  func.func @transform_2(%arg0: i32) -> (i32, i32) {
    %c0_i32 = arith.constant 0 : i32
    %c0_i32_0 = arith.constant 0 : i32
    %c0_i32_1 = arith.constant 0 : i32
    return %c0_i32, %c0_i32_0 : i32, i32
  }
  func.func @transform_3(%arg0: i32) -> (i32, i32) {
    %c0_i32 = arith.constant 0 : i32
    %c0_i32_0 = arith.constant 0 : i32
    return %arg0, %c0_i32 : i32, i32
  }
}

module attributes {stable_mosaic.version = 11 : i64} {
  func.func @_linear_kernel(%arg0: i32, %arg1: memref<16x32xf32, #tpu.memory_space<vmem>>, %arg2: memref<32x128xf32, #tpu.memory_space<vmem>>, %arg3: memref<1x128xf32, #tpu.memory_space<vmem>>, %arg4: memref<16x128xf32, #tpu.memory_space<vmem>>) attributes {dimension_semantics = [#tpu.dimension_semantics<parallel>], iteration_bounds = array<i64: 1>, scalar_prefetch = 0 : i64, scratch_operands = 0 : i64, tpu.core_type = #tpu.core_type<tc>, window_params = [{transform_indices = @transform_0, window_bounds = array<i64: 16, 32>}, {pipeline_mode = #tpu.pipeline_mode<synchronous>, transform_indices = @transform_1, window_bounds = array<i64: 32, 128>}, {pipeline_mode = #tpu.pipeline_mode<synchronous>, transform_indices = @transform_2, window_bounds = array<i64: 1, 128>}, {transform_indices = @transform_3, window_bounds = array<i64: 16, 128>}]} {
    %c0 = arith.constant 0 : index
    %c0_0 = arith.constant 0 : index
    %0 = vector.load %arg1[%c0, %c0_0] : memref<16x32xf32, #tpu.memory_space<vmem>>, vector<16x32xf32>
    %c0_1 = arith.constant 0 : index
    %c0_2 = arith.constant 0 : index
    %1 = vector.load %arg2[%c0_1, %c0_2] : memref<32x128xf32, #tpu.memory_space<vmem>>, vector<32x128xf32>
    %cst = arith.constant dense<0.000000e+00> : vector<16x128xf32>
    %2 = tpu.matmul %0, %1, %cst {dimension_numbers = #tpu.dot_dimension_numbers<[1], [0], [0], [1], [0, 0, 1, 1], [], []>} : vector<16x32xf32>, vector<32x128xf32>, vector<16x128xf32> -> vector<16x128xf32>
    %c0_3 = arith.constant 0 : index
    %c0_4 = arith.constant 0 : index
    %3 = vector.load %arg3[%c0_3, %c0_4] : memref<1x128xf32, #tpu.memory_space<vmem>>, vector<1x128xf32>
    %4 = vector.broadcast %3 : vector<1x128xf32> to vector<16x128xf32>
    %5 = arith.addf %2, %4 : vector<16x128xf32>
    %c0_5 = arith.constant 0 : index
    %c0_6 = arith.constant 0 : index
    %6 = vector.load %arg4[%c0_5, %c0_6] : memref<16x128xf32, #tpu.memory_space<vmem>>, vector<16x128xf32>
    tpu.vector_store %arg4[%c0_5, %c0_6], %5 {strides = array<i32>} : memref<16x128xf32, #tpu.memory_space<vmem>>, vector<16x128xf32>,
    return
  }
  func.func @transform_0(%arg0: i32) -> (i32, i32) {
    %c0_i32 = arith.constant 0 : i32
    %c0_i32_0 = arith.constant 0 : i32
    return %arg0, %c0_i32 : i32, i32
  }
  func.func @transform_1(%arg0: i32) -> (i32, i32) {
    %c0_i32 = arith.constant 0 : i32
    %c0_i32_0 = arith.constant 0 : i32
    %c0_i32_1 = arith.constant 0 : i32
    return %c0_i32, %c0_i32_0 : i32, i32
  }
  func.func @transform_2(%arg0: i32) -> (i32, i32) {
    %c0_i32 = arith.constant 0 : i32
    %c0_i32_0 = arith.constant 0 : i32
    %c0_i32_1 = arith.constant 0 : i32
    return %c0_i32, %c0_i32_0 : i32, i32
  }
  func.func @transform_3(%arg0: i32) -> (i32, i32) {
    %c0_i32 = arith.constant 0 : i32
    %c0_i32_0 = arith.constant 0 : i32
    return %arg0, %c0_i32 : i32, i32
  }
}

</mosaic_0001>

<bundles_post_ra>
// kernel: tener_forward.7
= control target key start
LH: loop header
LB: loop body
LE: loop exit
PB: predicated region body
PF: predicated region fallthrough
CT: control target
= control target key end

     0   :  { %vm25_vm0 = vcmask 130048   ;;  %vm107_vm1 = vcmask 261120   ;;  %s173_s1 = inlined_call_operand.vmem [shape: f32[16,32], index: 1, kind: input, shape index: {}]   ;;  %s174_s0 = inlined_call_operand.vmem [shape: f32[16,16], index: 0, kind: input, shape index: {}]   ;;  %s175_s2 = inlined_call_operand.vmem [shape: f32[1,32], index: 2, kind: input, shape index: {}]   ;;  %s176_s3 = inlined_call_operand.vmem [shape: f32[16,32], index: 3, kind: output, shape index: {}]  }
   0x1   :  { %v16_v0 = vld [vmem:[%s173_s1] sm:$0xff]  ;;  %v17_v1 = vld [vmem:[%s173_s1 + $0x8] sm:$0xff] }
   0x2   :  { %v14_v2 = vld [vmem:[%s174_s0] sm:$0xff]  ;;  %v128_v3 = vpack.c.bf16 %v17_v1, %v16_v0  ;;  %v15_v4 = vld [vmem:[%s174_s0 + $0x8] sm:$0xff] }
   0x3   :  { %125 = vmatprep.mubr.msk.f32.mxu0 %vm25_vm0, %v14_v2  ;;  %v114_v5 = vld [vmem:[%s175_s2] ss:$0 sm:$0xff] }
   0x4   :  { %129 = vmatprep.subr.bf16.mxu0 %v128_v3 }
   0x5   :  { %131 = vmatpush3.bf16.msra.mxu0 %v128_v3 }
   0x8   :  { %126 = vmatmul.mubr.msk.f32.vlgmr.msra.gmra.mrb[0].mxu0 %vm25_vm0, %v15_v4 }
  0xdb   :  { %v127_v6 = vpop.f32.mrb[0].mxu0 }
  0xdc   :  { %v104_v7 = vadd.f32 %v127_v6, %v114_v5  ;;  %v98_v8 = vpop.f32.mrb[1].mxu0 }
  0xdd   :  { %v99_v9 = vadd.f32 %v114_v5, %v98_v8 }
  0xde   :  { %109 = vst.msk [vmem:[%s176_s3 + $0x8] sm:$0xff] %vm107_vm1, %v104_v7 }
  0xdf   :  { %108 = vst.msk [vmem:[%s176_s3] sm:$0xff] %vm107_vm1, %v99_v9 }

// kernel: tener_forward.8
= control target key start
LH: loop header
LB: loop body
LE: loop exit
PB: predicated region body
PF: predicated region fallthrough
CT: control target
= control target key end

     0   :  { %vm17_vm0 = vcmask 261120   ;;  %vm99_vm1 = vcmask 523264   ;;  %s172_s1 = inlined_call_operand.vmem [shape: f32[32,64], index: 1, kind: input, shape index: {}]   ;;  %s173_s0 = inlined_call_operand.vmem [shape: f32[16,32], index: 0, kind: input, shape index: {}]   ;;  %s174_s2 = inlined_call_operand.vmem [shape: f32[16,64], index: 2, kind: output, shape index: {}]  }
   0x1   :  { %v13_v0 = vld [vmem:[%s172_s1] sm:$0xff]  ;;  %v14_v1 = vld [vmem:[%s172_s1 + $0x8] sm:$0xff]  ;;  %v15_v2 = vld [vmem:[%s172_s1 + $0x10] sm:$0xff] }
   0x2   :  { %v125_v3 = vpack.c.bf16 %v14_v1, %v13_v0  ;;  %v16_v4 = vld [vmem:[%s172_s1 + $0x18] sm:$0xff]  ;;  %v11_v5 = vld [vmem:[%s173_s0] sm:$0xff]  ;;  %v12_v7 = vld [vmem:[%s173_s0 + $0x8] sm:$0xff] }
   0x3   :  { %v129_v6 = vpack.c.bf16 %v16_v4, %v15_v2  ;;  %122 = vmatprep.mubr.msk.f32.mxu0 %vm17_vm0, %v11_v5 }
   0x4   :  { %126 = vmatprep.subr.bf16.mxu0 %v125_v3 }
   0x5   :  { %128 = vmatpush3.bf16.msra.mxu0 %v125_v3 }
   0x6   :  { %130 = vmatprep.subr.bf16.mxu0 %v129_v6 }
   0x9   :  { %132 = vmatpush3.bf16.msra.mxu0 %v129_v6 }
   0xc   :  { %123 = vmatmul.mubr.msk.f32.vlgmr.msra.gmra.mrb[0].mxu0 %vm17_vm0, %v12_v7 }
  0xdf   :  { %v124_v8 = vpop.f32.mrb[0].mxu0 }
  0xe0   :  { %101 = vst.msk [vmem:[%s174_s2 + $0x8] sm:$0xff] %vm99_vm1, %v124_v8  ;;  %v90_v9 = vpop.f32.mrb[1].mxu0 }
  0xe1   :  { %100 = vst.msk [vmem:[%s174_s2] sm:$0xff] %vm99_vm1, %v90_v9 }

// kernel: tener_forward.11
= control target key start
LH: loop header
LB: loop body
LE: loop exit
PB: predicated region body
PF: predicated region fallthrough
CT: control target
= control target key end

     0   :  { %vm27_vm0 = vcmask 261120   ;;  %s198_s1 = inlined_call_operand.vmem [shape: f32[32,32], index: 1, kind: input, shape index: {}]   ;;  %s199_s0 = inlined_call_operand.vmem [shape: f32[16,32], index: 0, kind: input, shape index: {}]   ;;  %s200_s2 = inlined_call_operand.vmem [shape: f32[1,32], index: 2, kind: input, shape index: {}]   ;;  %s201_s3 = inlined_call_operand.vmem [shape: f32[16,32], index: 3, kind: output, shape index: {}]  }
   0x1   :  { %v16_v0 = vld [vmem:[%s198_s1] sm:$0xff]  ;;  %v17_v1 = vld [vmem:[%s198_s1 + $0x8] sm:$0xff]  ;;  %v18_v2 = vld [vmem:[%s198_s1 + $0x10] sm:$0xff] }
   0x2   :  { %v139_v3 = vpack.c.bf16 %v17_v1, %v16_v0  ;;  %v19_v4 = vld [vmem:[%s198_s1 + $0x18] sm:$0xff]  ;;  %v14_v5 = vld [vmem:[%s199_s0] sm:$0xff]  ;;  %v15_v7 = vld [vmem:[%s199_s0 + $0x8] sm:$0xff] }
   0x3   :  { %v143_v6 = vpack.c.bf16 %v19_v4, %v18_v2  ;;  %136 = vmatprep.mubr.msk.f32.mxu0 %vm27_vm0, %v14_v5  ;;  %v119_v8 = vld [vmem:[%s200_s2] ss:$0 sm:$0xff] }
   0x4   :  { %140 = vmatprep.subr.bf16.mxu0 %v139_v3 }
   0x5   :  { %142 = vmatpush3.bf16.msra.mxu0 %v139_v3 }
   0x6   :  { %144 = vmatprep.subr.bf16.mxu0 %v143_v6 }
   0x9   :  { %146 = vmatpush3.bf16.msra.mxu0 %v143_v6 }
   0xc   :  { %137 = vmatmul.mubr.msk.f32.vlgmr.msra.gmra.mrb[0].mxu0 %vm27_vm0, %v15_v7 }
  0xdf   :  { %v138_v9 = vpop.f32.mrb[0].mxu0 }
  0xe0   :  { %v106_v10 = vadd.f32 %v138_v9, %v119_v8  ;;  %v100_v11 = vpop.f32.mrb[1].mxu0 }
  0xe1   :  { %v101_v12 = vadd.f32 %v119_v8, %v100_v11 }
  0xe2   :  { %v110_v13 = vmax.f32 %v106_v10, 0.0 }
  0xe3   :  { %v109_v14 = vmax.f32 %v101_v12, 0.0 }
  0xe4   :  { %v112_v15 = vadd.f32 %v110_v13, %v15_v7 }
  0xe5   :  { %v111_v16 = vadd.f32 %v109_v14, %v14_v5 }
  0xe6   :  { %114 = vst.msk [vmem:[%s201_s3 + $0x8] sm:$0xff] %vm27_vm0, %v112_v15 }
  0xe7   :  { %113 = vst.msk [vmem:[%s201_s3] sm:$0xff] %vm27_vm0, %v111_v16 }

// kernel: tener_forward.10
= control target key start
LH: loop header
LB: loop body
LE: loop exit
PB: predicated region body
PF: predicated region fallthrough
CT: control target
= control target key end

     0   :  { %vm16_vm0 = vcmask 261120   ;;  %s118_s0 = inlined_call_operand.vmem [shape: f32[16,32], index: 0, kind: input, shape index: {}]   ;;  %s119_s1 = inlined_call_operand.vmem [shape: f32[1,32], index: 1, kind: input, shape index: {}]   ;;  %s120_s2 = inlined_call_operand.vmem [shape: f32[1,32], index: 2, kind: input, shape index: {}]   ;;  %s121_s3 = inlined_call_operand.vmem [shape: f32[16,32], index: 3, kind: output, shape index: {}]  }
   0x1   :  { %v14_v0 = vld [vmem:[%s118_s0] sm:$0xff]  ;;  %v15_v1 = vld [vmem:[%s118_s0 + $0x8] sm:$0xff] }
   0x2   :  { %v17_v2 = vsel %vm16_vm0, %v14_v0, 0.0  ;;  %v20_v3 = vsel %vm16_vm0, %v15_v1, 0.0  ;;  %v68_v21 = vld [vmem:[%s119_s1] ss:$0 sm:$0xff] }
   0x3   :  { %18 = vadd.xlane.f32.xlu0 %v17_v2  ;;  %v69_v23 = vld [vmem:[%s120_s2] ss:$0 sm:$0xff] }
   0x7   :  { %21 = vadd.xlane.f32.xlu0 %v20_v3 }
  0x90   :  { %v19_v4 = vpop.xlane.xlu0 %18 }
  0x91   :  { %v24_v5 = vmul.f32 0.03125, %v19_v4 }
  0x93   :  { %v26_v6 = vsub.f32 %v14_v0, %v24_v5 }
  0x94   :  { %v22_v7 = vpop.xlane.xlu0 %21 }
  0x95   :  { %v25_v8 = vmul.f32 0.03125, %v22_v7  ;;  %v28_v9 = vmul.f32 %v26_v6, %v26_v6 }
  0x97   :  { %v27_v10 = vsub.f32 %v15_v1, %v25_v8  ;;  %v30_v11 = vsel %vm16_vm0, %v28_v9, 0.0 }
  0x98   :  { %31 = vadd.xlane.f32.xlu1 %v30_v11 }
  0x99   :  { %v29_v12 = vmul.f32 %v27_v10, %v27_v10 }
  0x9b   :  { %v33_v13 = vsel %vm16_vm0, %v29_v12, 0.0 }
  0x9c   :  { %34 = vadd.xlane.f32.xlu1 %v33_v13 }
 0x125   :  { %v32_v14 = vpop.xlane.xlu1 %31 }
 0x126   :  { %v36_v15 = vmul.f32 0.03125, %v32_v14 }
 0x128   :  { %v38_v16 = vadd.f32 1e-05, %v36_v15 }
 0x129   :  { %v35_v17 = vpop.xlane.xlu1 %34 }
 0x12a   :  { %70 = vrsqrt.f32 %v38_v16  ;;  %v37_v18 = vmul.f32 0.03125, %v35_v17 }
 0x12c   :  { %v39_v19 = vadd.f32 1e-05, %v37_v18 }
 0x12e   :  { %72 = vrsqrt.f32 %v39_v19 }
 0x134   :  { %v71_v20 = vpop.eup %70 }
 0x135   :  { %v42_v22 = vmul.f32 %v71_v20, %v26_v6 }
 0x137   :  { %v51_v24 = vmul.f32 %v68_v21, %v42_v22 }
 0x138   :  { %v73_v25 = vpop.eup %72 }
 0x139   :  { %v60_v26 = vadd.f32 %v69_v23, %v51_v24  ;;  %v43_v27 = vmul.f32 %v73_v25, %v27_v10 }
 0x13b   :  { %62 = vst.msk [vmem:[%s121_s3] sm:$0xff] %vm16_vm0, %v60_v26  ;;  %v52_v28 = vmul.f32 %v68_v21, %v43_v27 }
 0x13d   :  { %v61_v29 = vadd.f32 %v69_v23, %v52_v28 }
 0x13f   :  { %63 = vst.msk [vmem:[%s121_s3 + $0x8] sm:$0xff] %vm16_vm0, %v61_v29 }

// kernel: tener_forward.13
= control target key start
LH: loop header
LB: loop body
LE: loop exit
PB: predicated region body
PF: predicated region fallthrough
CT: control target
= control target key end

     0   :  { %vm27_vm0 = vcmask 261120   ;;  %s190_s1 = inlined_call_operand.vmem [shape: f32[32,128], index: 1, kind: input, shape index: {}]   ;;  %s191_s0 = inlined_call_operand.vmem [shape: f32[16,32], index: 0, kind: input, shape index: {}]   ;;  %s192_s2 = inlined_call_operand.vmem [shape: f32[1,128], index: 2, kind: input, shape index: {}]   ;;  %s193_s3 = inlined_call_operand.vmem [shape: f32[16,128], index: 3, kind: output, shape index: {}]  }
   0x1   :  { %v16_v0 = vld [vmem:[%s190_s1] sm:$0xff]  ;;  %v17_v1 = vld [vmem:[%s190_s1 + $0x8] sm:$0xff]  ;;  %v18_v2 = vld [vmem:[%s190_s1 + $0x10] sm:$0xff] }
   0x2   :  { %v135_v3 = vpack.c.bf16 %v17_v1, %v16_v0  ;;  %v19_v4 = vld [vmem:[%s190_s1 + $0x18] sm:$0xff]  ;;  %v14_v5 = vld [vmem:[%s191_s0] sm:$0xff]  ;;  %v15_v7 = vld [vmem:[%s191_s0 + $0x8] sm:$0xff] }
   0x3   :  { %v139_v6 = vpack.c.bf16 %v19_v4, %v18_v2  ;;  %132 = vmatprep.mubr.msk.f32.mxu0 %vm27_vm0, %v14_v5  ;;  %v115_v8 = vld [vmem:[%s192_s2] ss:$0 sm:$0xff] }
   0x4   :  { %136 = vmatprep.subr.bf16.mxu0 %v135_v3 }
   0x5   :  { %138 = vmatpush3.bf16.msra.mxu0 %v135_v3 }
   0x6   :  { %140 = vmatprep.subr.bf16.mxu0 %v139_v6 }
   0x9   :  { %142 = vmatpush3.bf16.msra.mxu0 %v139_v6 }
   0xc   :  { %133 = vmatmul.mubr.msk.f32.vlgmr.msra.gmra.mrb[0].mxu0 %vm27_vm0, %v15_v7 }
  0xdf   :  { %v134_v9 = vpop.f32.mrb[0].mxu0 }
  0xe0   :  { %v106_v10 = vadd.f32 %v134_v9, %v115_v8  ;;  %v100_v11 = vpop.f32.mrb[1].mxu0 }
  0xe1   :  { %v101_v12 = vadd.f32 %v115_v8, %v100_v11 }
  0xe2   :  { %110 = vst [vmem:[%s193_s3 + $0x8] sm:$0xff] %v106_v10 }
  0xe3   :  { %109 = vst [vmem:[%s193_s3] sm:$0xff] %v101_v12 }

// kernel: tener_forward.9
= control target key start
LH: loop header
LB: loop body
LE: loop exit
PB: predicated region body
PF: predicated region fallthrough
CT: control target
= control target key end

     0   :  { %s2138_s24 = smov 0   ;;  %s2518_s0 = inlined_call_operand.vmem [shape: f32[2,8,32], index: 0, kind: input, shape index: {}]   ;;  %s2519_s1 = inlined_call_operand.vmem [shape: f32[2,8,32], index: 1, kind: input, shape index: {}]   ;;  %s2520_s2 = inlined_call_operand.vmem [shape: f32[2,8,32], index: 2, kind: input, shape index: {}]   ;;  %s2521_s3 = inlined_call_operand.vmem [shape: f32[128,8], index: 3, kind: input, shape index: {}]   ;;  %s2522_s4 = inlined_call_operand.vmem [shape: f32[4,8], index: 4, kind: input, shape index: {}]   ;;  %s2523_s5 = inlined_call_operand.vmem [shape: f32[4,8], index: 5, kind: input, shape index: {}]   ;;  %s2524_s6 = inlined_call_operand.vmem [shape: f32[2,1,8], index: 6, kind: input, shape index: {}]   ;;  %s2525_s7 = inlined_call_operand.vmem [shape: f32[2,8,32], index: 7, kind: output, shape index: {}]  }
   0x1 LB: > { %s1553_s25 = sadd.s32 4294967295, %s2085_s24   ;;  %p1557_p0 = scmp.ge.s32.totalorder %s2085_s24, 1  ;;  %s2085_s24 = sphi %s2138_s24, %s17_s24  }
   0x2   : > { %p262_p1 = scmp.lt.s32.totalorder %s2085_s24, 3 }
   0x4   : > { %p263_p2 = pnand %p1557_p0, %p262_p1 }
   0x5   : > { %v325_v0 = vld [vmem:[%s2521_s3] sm:$0xff] (!%p263_p2)  ;;  %v326_v1 = vld [vmem:[%s2521_s3 + $0x8] sm:$0xff] (!%p263_p2)  ;;  %vm354_vm0 = vcmask (!%p263_p2), 64512   ;;  %v2087_v2 = vmov (!%p263_p2), 0.0|0.0   ;;  %p303_p3 = scmp.lt.s32.totalorder (!%p263_p2), %s1553_s25, 1  ;;  %vm2088_vm2 = vmmov (!%p263_p2), 0   ;;  %v558_v37 = vlaneseq (!%p263_p2) }
   0x6   : > { %266 = sbr.rel (%p263_p2) target bundleno = 3302 (0xce6), region = 48  ;;  %1916 = vmatprep.subr.bf16.mxu0 (!%p263_p2), %v2087_v2  ;;  %v2153_v3 = vpack.c.bf16 (!%p263_p2), %v326_v1, %v325_v0  ;;  %vm2157_vm1 = vmpackc.low (!%p263_p2), %vm354_vm0, %vm354_vm0  ;;  %v2089_v5 = vmov (!%p263_p2), 0.0   ;;  %v327_v6 = vld [vmem:[%s2521_s3 + $0x10] sm:$0xff] (!%p263_p2)  ;;  %v328_v7 = vld [vmem:[%s2521_s3 + $0x18] sm:$0xff] (!%p263_p2)  ;;  %s2090_s28 = smov (!%p263_p2), 376   ;;  %v2091_v41 = vmov (!%p263_p2), 0  }
   0x7   : > { %1768 = vmatprep.mubr.msk.f32.mxu0 (!%p263_p2), %vm2088_vm2, %v2089_v5  ;;  %1771 = vmatprep.subr.mxu1 (!%p263_p2), %v2089_v5  ;;  %v1562_v8 = vld [vmem:[%s2522_s4] ss:$0 sm:$0xff] (!%p263_p2)  ;;  %v2192_v9 = vpack.c.bf16 (!%p263_p2), %v328_v7, %v327_v6  ;;  %v330_v14 = vld [vmem:[%s2521_s3 + $0x28] sm:$0xff] (!%p263_p2)  ;;  %v331_v16 = vld [vmem:[%s2521_s3 + $0x30] sm:$0xff] (!%p263_p2)  ;;  %v559_v39 = vshrl.u32 (!%p263_p2), %v558_v37, 7  ;;  %s2092_s10 = smov (!%p263_p2), 8  }
   0x8   : > { %1919 = vmatpush3.bf16.xpose.msk.msra.mxu0 (!%p263_p2), %vm2157_vm1, %v2153_v3  ;;  %1773 = vmatprep.mubr.msk.f32.mxu1 (!%p263_p2), %vm2088_vm2, %v2089_v5  ;;  %v329_v13 = vld [vmem:[%s2521_s3 + $0x20] sm:$0xff] (!%p263_p2)  ;;  %v332_v17 = vld [vmem:[%s2521_s3 + $0x38] sm:$0xff] (!%p263_p2)  ;;  %v334_v20 = vld [vmem:[%s2521_s3 + $0x48] sm:$0xff] (!%p263_p2)  ;;  %s2094_s20 = smov (!%p263_p2), 16   ;;  %s2095_s23 = smov (!%p263_p2), 112   ;;  %vm1460_vm5 = vcmask (!%p263_p2), 130048  }
   0x9   : > { %1920 = vmatprep.subr.bf16.mxu0 (!%p263_p2), %v2087_v2  ;;  %v2215_v15 = vpack.c.bf16 (!%p263_p2), %v330_v14, %v329_v13  ;;  %v2227_v18 = vpack.c.bf16 (!%p263_p2), %v332_v17, %v331_v16  ;;  %v333_v19 = vld [vmem:[%s2521_s3 + $0x40] sm:$0xff] (!%p263_p2)  ;;  %v335_v22 = vld [vmem:[%s2521_s3 + $0x50] sm:$0xff] (!%p263_p2)  ;;  %v336_v23 = vld [vmem:[%s2521_s3 + $0x58] sm:$0xff] (!%p263_p2)  ;;  %v560_v40 = vsub.s32 (!%p263_p2), 0, %v559_v39  ;;  %vm1462_vm6 = vcmask (!%p263_p2), 195584  }
   0xa   : > { %v2239_v21 = vpack.c.bf16 (!%p263_p2), %v334_v20, %v333_v19  ;;  %v2251_v24 = vpack.c.bf16 (!%p263_p2), %v336_v23, %v335_v22  ;;  %v337_v25 = vld [vmem:[%s2521_s3 + $0x60] sm:$0xff] (!%p263_p2)  ;;  %v338_v26 = vld [vmem:[%s2521_s3 + $0x68] sm:$0xff] (!%p263_p2)  ;;  %v339_v28 = vld [vmem:[%s2521_s3 + $0x70] sm:$0xff] (!%p263_p2)  ;;  %vm1465_vm7 = vcmask (!%p263_p2), 261120  }
   0xb   : > { %v2263_v27 = vpack.c.bf16 (!%p263_p2), %v338_v26, %v337_v25  ;;  %v340_v29 = vld [vmem:[%s2521_s3 + $0x78] sm:$0xff] (!%p263_p2)  ;;  %v1563_v31 = vld [vmem:[%s2523_s5] ss:$0 sm:$0xff] (!%p263_p2)  ;;  %v1585_v53 = vld [vmem:[%s2523_s5 + $0x1] ss:$0 sm:$0xff] (!%p263_p2) }
   0xc   : > { %v2275_v30 = vpack.c.bf16 (!%p263_p2), %v340_v29, %v339_v28  ;;  %v1584_v54 = vld [vmem:[%s2522_s4 + $0x1] ss:$0 sm:$0xff] (!%p263_p2)  ;;  %v1606_v29 = vld [vmem:[%s2522_s4 + $0x2] ss:$0 sm:$0xff] (!%p263_p2) }
   0xd   : > { %s2529_s25 = smov (!%p303_p3, %s1553_s25), 1 }
   0xe   : > { %s2179_s11 = sshll.u32 %s2529_s25, 3  ;;  %s317_s8 = scalar_lea.vmem %s2524_s6, %s2529_s25 }
   0xf   : > { %s310_s14 = scalar_lea.vmem %s2519_s1, %s2179_s11  ;;  %s306_s17 = scalar_lea.vmem %s2518_s0, %s2179_s11  ;;  %v341_v38 = vld [vmem:[%s317_s8] sm:$0x1] }
  0x10   : > { %v2194_v10 = vld [vmem:[%s310_s14] sm:$0xff]  ;;  %1923 = vmatpush3.bf16.xpose.msk.msra.mxu0 %vm2157_vm1, %v2192_v9  ;;  %vm556_vm3 = vcmp.eq.f32.partialorder %v341_v38, 0.0  ;;  %s314_s16 = scalar_lea.vmem %s2520_s2, %s2179_s11  ;;  %s2096_s8 = smov 24  }
  0x11   : > { %v2196_v11 = vld [vmem:[%s306_s17] sm:$0xff]  ;;  %v348_v12 = vadd.f32 %v1562_v8, %v2194_v10  ;;  %1924 = vmatprep.subr.bf16.mxu0 %v2087_v2  ;;  %v353_v32 = vadd.f32 %v1563_v31, %v2194_v10  ;;  %v557_v42 = vsel %vm556_vm3, 1, %v2091_v41  ;;  %s2093_s17 = smov 120   ;;  %s2097_s25 = smov 104  }
  0x12   : > { %1772 = vmatpush3.xpose.msk.msra.mxu1 %vm354_vm0, %v2196_v11  ;;  %v2293_v43 = vrot.slane %v557_v42, %v560_v40  ;;  %v2312_v55 = vld [vmem:[%s314_s16] sm:$0xff] }
  0x13   : > { %1776 = vmatprep.subr.mxu1 %v2089_v5  ;;  %v1607_v31 = vld [vmem:[%s2523_s5 + $0x2] ss:$0 sm:$0xff] }
  0x14   : > { %vm562_vm4 = vcmp.eq.s32.totalorder %v2293_v43, 1 }
  0x15   : > { %1774 = vmatmul.mubr.msk.f32.vlgmr.msra.gmra.mrb[0].mxu1 %vm354_vm0, %v348_v12 }
  0x16   : > { %1778 = vmatprep.mubr.msk.f32.mxu1 %vm2088_vm2, %v2089_v5  ;;  %1777 = vmatpush3.msra.mxu1 %v2312_v55 }
  0x17   : > { %1948 = vmatprep.subr.bf16.mxu1 %v2087_v2 }
  0x18   : > { %1927 = vmatpush3.bf16.xpose.msk.msra.mxu0 %vm2157_vm1, %v2215_v15 }
  0x19   : > { %1928 = vmatprep.subr.bf16.mxu0 %v2087_v2 }
  0x20   : > { %1931 = vmatpush3.bf16.xpose.msk.msra.mxu0 %vm2157_vm1, %v2227_v18 }
  0x21   : > { %1932 = vmatprep.subr.bf16.mxu0 %v2087_v2 }
  0x28   : > { %1935 = vmatpush3.bf16.xpose.msk.msra.mxu0 %vm2157_vm1, %v2239_v21 }
  0x29   : > { %1936 = vmatprep.subr.bf16.mxu0 %v2087_v2 }
  0x30   : > { %1939 = vmatpush3.bf16.xpose.msk.msra.mxu0 %vm2157_vm1, %v2251_v24 }
  0x31   : > { %1940 = vmatprep.subr.bf16.mxu0 %v2087_v2 }
  0x38   : > { %1943 = vmatpush3.bf16.xpose.msk.msra.mxu0 %vm2157_vm1, %v2263_v27 }
  0x39   : > { %1944 = vmatprep.subr.bf16.mxu0 %v2087_v2 }
  0x40   : > { %1947 = vmatpush3.bf16.xpose.msk.msra.mxu0 %vm2157_vm1, %v2275_v30 }
  0x41   : > { %1816 = vmatprep.subr.mxu0 %v2089_v5 }
  0x47   : > { %1769 = vmatmul.mubr.msk.f32.vlgmr.msra.gmra.mrb[0].mxu0 %vm354_vm0, %v353_v32 }
  0x48   : > { %1818 = vmatprep.mubr.msk.f32.mxu0 %vm2088_vm2, %v2089_v5 }
  0xe8   : > { %v552_v33 = vpop.f32.mrb[0].mxu1 }
  0xe9   : > { %v1775_v34 = vpop.f32.mrb[1].mxu1 }
 0x11a   : > { %v472_v35 = vpop.f32.mrb[0].mxu0 }
 0x11b   : > { %478 = vrot.lane.b32.xlu0 %v472_v35, %s2090_s28  ;;  %v1770_v36 = vpop.f32.mrb[1].mxu0 }
 0x18d   : > { %v479_v44 = vpop.permute.xlu0 %478 }
 0x18e   : > { %v553_v45 = vadd.f32 %v552_v33, %v479_v44 }
 0x190   : > { %v563_v46 = vsel %vm562_vm4, -1e+30, %v553_v45 }
 0x191   : > { %v564_v47 = vsel %vm354_vm0, %v563_v46, -inf }
 0x192   : > { %565 = vmax.xlane.f32.xlu0 %v564_v47 }
 0x21f   : > { %v566_v48 = vpop.xlane.xlu0 %565 }
 0x220   : > { %v567_v49 = vsub.f32 %v563_v46, %v566_v48 }
 0x222   : > { %v568_v50 = vmul.f32 1.442695, %v567_v49 }
 0x224   : > { %2063 = vpow2.f32 %v568_v50 }
 0x22e   : > { %v2064_v51 = vpop.eup %2063 }
 0x22f   : > { %v570_v52 = vsel %vm354_vm0, %v2064_v51, 0.0 }
 0x230   : > { %571 = vadd.xlane.f32.xlu1 %v570_v52 }
 0x241   : > { %664 = vrot.lane.b32.xlu1 %v1585_v53, %s2092_s10 }
 0x245   : > { %655 = vrot.lane.b32.xlu1 %v1584_v54, %s2092_s10 }
 0x2bd   : > { %v572_v56 = vpop.xlane.xlu1 %571 }
 0x2be   : > { %2065 = vrcp.f32 %v572_v56 }
 0x2c1   : > { %v665_v57 = vpop.permute.xlu1 %664 }
 0x2c2   : > { %v667_v58 = vadd.f32 %v665_v57, %v2194_v10 }
 0x2c4   : > { %669 = vrot.lane.b32.xlu1 %v667_v58, %s2093_s17 }
 0x2c5   : > { %v656_v59 = vpop.permute.xlu1 %655 }
 0x2c6   : > { %v658_v61 = vadd.f32 %v656_v59, %v2194_v10 }
 0x2c8   : > { %v2066_v60 = vpop.eup %2065  ;;  %750 = vrot.lane.b32.xlu1 %v2196_v11, %s2093_s17 }
 0x2c9   : > { %v574_v62 = vmul.f32 %v2066_v60, %v2064_v51  ;;  %v1629_v60 = vld [vmem:[%s2523_s5 + $0x3] ss:$0 sm:$0xff] }
 0x2cb   : > { %1779 = vmatmul.mubr.msk.f32.vlgmr.msra.gmra.mrb[2].mxu1 %vm354_vm0, %v574_v62 }
 0x2cc   : > { %1951 = vmatpush3.bf16.xpose.msk.msra.mxu1 %vm2157_vm1, %v2153_v3  ;;  %748 = vrot.lane.b32.xlu1 %v658_v61, %s2093_s17  ;;  %v1628_v61 = vld [vmem:[%s2522_s4 + $0x3] ss:$0 sm:$0xff] }
 0x2cd   : > { %1952 = vmatprep.subr.bf16.mxu1 %v2087_v2  ;;  %1813 = vmatprep.mubr.msk.f32.mxu1 %vm2088_vm2, %v2089_v5 }
 0x2d4   : > { %1955 = vmatpush3.bf16.xpose.msk.msra.mxu1 %vm2157_vm1, %v2192_v9 }
 0x2d5   : > { %1956 = vmatprep.subr.bf16.mxu1 %v2087_v2 }
 0x2dc   : > { %1959 = vmatpush3.bf16.xpose.msk.msra.mxu1 %vm2157_vm1, %v2215_v15 }
 0x2dd   : > { %1960 = vmatprep.subr.bf16.mxu1 %v2087_v2 }
 0x2e4   : > { %1963 = vmatpush3.bf16.xpose.msk.msra.mxu1 %vm2157_vm1, %v2227_v18 }
 0x2e5   : > { %1964 = vmatprep.subr.bf16.mxu1 %v2087_v2 }
 0x2ec   : > { %1967 = vmatpush3.bf16.xpose.msk.msra.mxu1 %vm2157_vm1, %v2239_v21 }
 0x2ed   : > { %1968 = vmatprep.subr.bf16.mxu1 %v2087_v2 }
 0x2f4   : > { %1971 = vmatpush3.bf16.xpose.msk.msra.mxu1 %vm2157_vm1, %v2251_v24 }
 0x2f5   : > { %1972 = vmatprep.subr.bf16.mxu1 %v2087_v2 }
 0x2fc   : > { %1975 = vmatpush3.bf16.xpose.msk.msra.mxu1 %vm2157_vm1, %v2263_v27 }
 0x2fd   : > { %1976 = vmatprep.subr.bf16.mxu1 %v2087_v2 }
 0x304   : > { %1979 = vmatpush3.bf16.xpose.msk.msra.mxu1 %vm2157_vm1, %v2275_v30 }
 0x305   : > { %1861 = vmatprep.subr.mxu1 %v2089_v5 }
 0x336   : > { %v670_v63 = vpop.permute.xlu1 %669 }
 0x337   : > { %1814 = vmatmul.mubr.msk.f32.vlgmr.msra.gmra.mrb[4].mxu1 %vm354_vm0, %v670_v63 }
 0x338   : > { %1863 = vmatprep.mubr.msk.f32.mxu1 %vm2088_vm2, %v2089_v5 }
 0x33a   : > { %v751_v0 = vpop.permute.xlu1 %750 }
 0x33b   : > { %1817 = vmatpush3.xpose.msk.msra.mxu0 %vm354_vm0, %v751_v0 }
 0x33c   : > { %1821 = vmatprep.subr.mxu0 %v2089_v5 }
 0x33e   : > { %v749_v1 = vpop.permute.xlu1 %748 }
 0x33f   : > { %1819 = vmatmul.mubr.msk.f32.vlgmr.msra.gmra.mrb[2].mxu0 %vm354_vm0, %v749_v1 }
 0x340   : > { %1823 = vmatprep.mubr.msk.f32.mxu0 %vm2088_vm2, %v2089_v5 }
 0x39e   : > { %v2365_v6 = vpop.f32.mrb[2].mxu1 }
 0x39f   : > { %v1780_v7 = vpop.f32.mrb[3].mxu1 }
 0x40a   : > { %v739_v8 = vpop.f32.mrb[4].mxu1 }
 0x40b   : > { %745 = vrot.lane.b32.xlu0 %v739_v8, %s2090_s28  ;;  %v1815_v12 = vpop.f32.mrb[5].mxu1 }
 0x412   : > { %v822_v13 = vpop.f32.mrb[2].mxu0 }
 0x413   : > { %v1820_v14 = vpop.f32.mrb[3].mxu0 }
 0x47d   : > { %v746_v16 = vpop.permute.xlu0 %745 }
 0x47e   : > { %v823_v17 = vadd.f32 %v822_v13, %v746_v16 }
 0x480   : > { %v826_v19 = vsel %vm562_vm4, -1e+30, %v823_v17 }
 0x481   : > { %v827_v20 = vsel %vm354_vm0, %v826_v19, -inf }
 0x482   : > { %828 = vmax.xlane.f32.xlu1 %v827_v20 }
 0x493   : > { %839 = vrot.lane.b32.xlu1 %v2312_v55, %s2093_s17 }
 0x497   : > { %922 = vrot.lane.b32.xlu1 %v1606_v29, %s2094_s20 }
 0x50f   : > { %v829_v22 = vpop.xlane.xlu1 %828 }
 0x510   : > { %v830_v23 = vsub.f32 %v826_v19, %v829_v22 }
 0x512   : > { %v831_v25 = vmul.f32 1.442695, %v830_v23 }
 0x513   : > { %v840_v32 = vpop.permute.xlu1 %839 }
 0x514   : > { %2067 = vpow2.f32 %v831_v25  ;;  %1822 = vmatpush3.msra.mxu0 %v840_v32 }
 0x515   : > { %1980 = vmatprep.subr.bf16.mxu0 %v2087_v2 }
 0x517   : > { %v923_v36 = vpop.permute.xlu1 %922 }
 0x518   : > { %v925_v38 = vadd.f32 %v923_v36, %v2194_v10 }
 0x51e   : > { %v2068_v26 = vpop.eup %2067 }
 0x51f   : > { %v833_v28 = vsel %vm354_vm0, %v2068_v26, 0.0 }
 0x520   : > { %834 = vadd.xlane.f32.xlu0 %v833_v28 }
 0x536   : > { %931 = vrot.lane.b32.xlu0 %v1607_v31, %s2094_s20 }
 0x5ad   : > { %v835_v33 = vpop.xlane.xlu0 %834 }
 0x5ae   : > { %2069 = vrcp.f32 %v835_v33 }
 0x5b1   : > { %v932_v34 = vpop.permute.xlu0 %931 }
 0x5b2   : > { %v934_v35 = vadd.f32 %v932_v34, %v2194_v10 }
 0x5b4   : > { %936 = vrot.lane.b32.xlu1 %v934_v35, %s2095_s23 }
 0x5b8   : > { %v2070_v37 = vpop.eup %2069  ;;  %1017 = vrot.lane.b32.xlu1 %v2196_v11, %s2095_s23 }
 0x5b9   : > { %v837_v39 = vmul.f32 %v2070_v37, %v2068_v26 }
 0x5bb   : > { %1824 = vmatmul.mubr.msk.f32.vlgmr.msra.gmra.mrb[4].mxu0 %vm354_vm0, %v837_v39 }
 0x5bc   : > { %1983 = vmatpush3.bf16.xpose.msk.msra.mxu0 %vm2157_vm1, %v2153_v3  ;;  %1015 = vrot.lane.b32.xlu1 %v925_v38, %s2095_s23 }
 0x5bd   : > { %1984 = vmatprep.subr.bf16.mxu0 %v2087_v2  ;;  %1858 = vmatprep.mubr.msk.f32.mxu0 %vm2088_vm2, %v2089_v5 }
 0x5c4   : > { %1987 = vmatpush3.bf16.xpose.msk.msra.mxu0 %vm2157_vm1, %v2192_v9 }
 0x5c5   : > { %1988 = vmatprep.subr.bf16.mxu0 %v2087_v2 }
 0x5cc   : > { %1991 = vmatpush3.bf16.xpose.msk.msra.mxu0 %vm2157_vm1, %v2215_v15 }
 0x5cd   : > { %1992 = vmatprep.subr.bf16.mxu0 %v2087_v2 }
 0x5d4   : > { %1995 = vmatpush3.bf16.xpose.msk.msra.mxu0 %vm2157_vm1, %v2227_v18 }
 0x5d5   : > { %1996 = vmatprep.subr.bf16.mxu0 %v2087_v2 }
 0x5dc   : > { %1999 = vmatpush3.bf16.xpose.msk.msra.mxu0 %vm2157_vm1, %v2239_v21 }
 0x5dd   : > { %2000 = vmatprep.subr.bf16.mxu0 %v2087_v2 }
 0x5e4   : > { %2003 = vmatpush3.bf16.xpose.msk.msra.mxu0 %vm2157_vm1, %v2251_v24 }
 0x5e5   : > { %2004 = vmatprep.subr.bf16.mxu0 %v2087_v2 }
 0x5ec   : > { %2007 = vmatpush3.bf16.xpose.msk.msra.mxu0 %vm2157_vm1, %v2263_v27 }
 0x5ed   : > { %2008 = vmatprep.subr.bf16.mxu0 %v2087_v2 }
 0x5f4   : > { %2011 = vmatpush3.bf16.xpose.msk.msra.mxu0 %vm2157_vm1, %v2275_v30 }
 0x5f5   : > { %1906 = vmatprep.subr.mxu0 %v2089_v5 }
 0x626   : > { %v937_v40 = vpop.permute.xlu1 %936 }
 0x627   : > { %1859 = vmatmul.mubr.msk.f32.vlgmr.msra.gmra.mrb[6].mxu0 %vm354_vm0, %v937_v40 }
 0x628   : > { %1908 = vmatprep.mubr.msk.f32.mxu0 %vm2088_vm2, %v2089_v5 }
 0x62a   : > { %v1018_v41 = vpop.permute.xlu1 %1017 }
 0x62b   : > { %1862 = vmatpush3.xpose.msk.msra.mxu1 %vm354_vm0, %v1018_v41 }
 0x62c   : > { %1866 = vmatprep.subr.mxu1 %v2089_v5 }
 0x62e   : > { %v1016_v42 = vpop.permute.xlu1 %1015 }
 0x62f   : > { %1864 = vmatmul.mubr.msk.f32.vlgmr.msra.gmra.mrb[6].mxu1 %vm354_vm0, %v1016_v42 }
 0x630   : > { %1868 = vmatprep.mubr.msk.f32.mxu1 %vm2088_vm2, %v2089_v5 }
 0x68e   : > { %v2432_v44 = vpop.f32.mrb[4].mxu0 }
 0x68f   : > { %v1825_v45 = vpop.f32.mrb[5].mxu0 }
 0x6fa   : > { %v1006_v46 = vpop.f32.mrb[6].mxu0 }
 0x6fb   : > { %1012 = vrot.lane.b32.xlu1 %v1006_v46, %s2090_s28  ;;  %v1860_v47 = vpop.f32.mrb[7].mxu0 }
 0x702   : > { %v1089_v48 = vpop.f32.mrb[6].mxu1 }
 0x703   : > { %v1865_v49 = vpop.f32.mrb[7].mxu1 }
 0x76d   : > { %v1013_v50 = vpop.permute.xlu1 %1012 }
 0x76e   : > { %v1090_v51 = vadd.f32 %v1089_v48, %v1013_v50 }
 0x770   : > { %v1093_v52 = vsel %vm562_vm4, -1e+30, %v1090_v51 }
 0x771   : > { %v1094_v53 = vsel %vm354_vm0, %v1093_v52, -inf }
 0x772   : > { %1095 = vmax.xlane.f32.xlu0 %v1094_v53 }
 0x788   : > { %1105 = vrot.lane.b32.xlu0 %v2312_v55, %s2095_s23 }
 0x78c   : > { %1188 = vrot.lane.b32.xlu0 %v1628_v61, %s2096_s8 }
 0x790   : > { %1283 = vrot.lane.b32.xlu0 %v2196_v11, %s2097_s25 }
 0x7ff   : > { %v1096_v54 = vpop.xlane.xlu0 %1095 }
 0x800   : > { %v1097_v56 = vsub.f32 %v1093_v52, %v1096_v54 }
 0x802   : > { %v1098_v57 = vmul.f32 1.442695, %v1097_v56 }
 0x803   : > { %v1106_v62 = vpop.permute.xlu0 %1105 }
 0x804   : > { %2071 = vpow2.f32 %v1098_v57  ;;  %1867 = vmatpush3.msra.mxu1 %v1106_v62 }
 0x805   : > { %2012 = vmatprep.subr.bf16.mxu1 %v2087_v2 }
 0x807   : > { %v1189_v1 = vpop.permute.xlu0 %1188 }
 0x808   : > { %v1191_v8 = vadd.f32 %v1189_v1, %v2194_v10 }
 0x80e   : > { %v2072_v58 = vpop.eup %2071 }
 0x80f   : > { %v1100_v59 = vsel %vm354_vm0, %v2072_v58, 0.0 }
 0x810   : > { %1101 = vadd.xlane.f32.xlu1 %v1100_v59 }
 0x821   : > { %1197 = vrot.lane.b32.xlu1 %v1629_v60, %s2096_s8 }
 0x89d   : > { %v1102_v63 = vpop.xlane.xlu1 %1101 }
 0x89e   : > { %2073 = vrcp.f32 %v1102_v63 }
 0x8a1   : > { %v1198_v0 = vpop.permute.xlu1 %1197 }
 0x8a2   : > { %v1200_v7 = vadd.f32 %v1198_v0, %v2194_v10 }
 0x8a4   : > { %1202 = vrot.lane.b32.xlu1 %v1200_v7, %s2097_s25 }
 0x8a8   : > { %v2074_v12 = vpop.eup %2073  ;;  %1281 = vrot.lane.b32.xlu1 %v1191_v8, %s2097_s25 }
 0x8a9   : > { %v1104_v13 = vmul.f32 %v2074_v12, %v2072_v58 }
 0x8ab   : > { %1869 = vmatmul.mubr.msk.f32.vlgmr.msra.gmra.mrb[8].mxu1 %vm354_vm0, %v1104_v13 }
 0x8ac   : > { %2015 = vmatpush3.bf16.xpose.msk.msra.mxu1 %vm2157_vm1, %v2153_v3  ;;  %1903 = vmatprep.mubr.msk.f32.mxu1 %vm2088_vm2, %v2089_v5  ;;  %v1284_v3 = vpop.permute.xlu0 %1283 }
 0x8ad   : > { %2016 = vmatprep.subr.bf16.mxu1 %v2087_v2  ;;  %1907 = vmatpush3.xpose.msk.msra.mxu0 %vm354_vm0, %v1284_v3 }
 0x8ae   : > { %1911 = vmatprep.subr.mxu0 %v2089_v5 }
 0x8b4   : > { %2019 = vmatpush3.bf16.xpose.msk.msra.mxu1 %vm2157_vm1, %v2192_v9 }
 0x8b5   : > { %2020 = vmatprep.subr.bf16.mxu1 %v2087_v2 }
 0x8bc   : > { %2023 = vmatpush3.bf16.xpose.msk.msra.mxu1 %vm2157_vm1, %v2215_v15 }
 0x8bd   : > { %2024 = vmatprep.subr.bf16.mxu1 %v2087_v2 }
 0x8c4   : > { %2027 = vmatpush3.bf16.xpose.msk.msra.mxu1 %vm2157_vm1, %v2227_v18 }
 0x8c5   : > { %2028 = vmatprep.subr.bf16.mxu1 %v2087_v2 }
 0x8cc   : > { %2031 = vmatpush3.bf16.xpose.msk.msra.mxu1 %vm2157_vm1, %v2239_v21 }
 0x8cd   : > { %2032 = vmatprep.subr.bf16.mxu1 %v2087_v2 }
 0x8d4   : > { %2035 = vmatpush3.bf16.xpose.msk.msra.mxu1 %vm2157_vm1, %v2251_v24 }
 0x8d5   : > { %2036 = vmatprep.subr.bf16.mxu1 %v2087_v2 }
 0x8dc   : > { %2039 = vmatpush3.bf16.xpose.msk.msra.mxu1 %vm2157_vm1, %v2263_v27 }
 0x8dd   : > { %2040 = vmatprep.subr.bf16.mxu1 %v2087_v2 }
 0x8e4   : > { %2043 = vmatpush3.bf16.xpose.msk.msra.mxu1 %vm2157_vm1, %v2275_v30 }
 0x916   : > { %v1203_v9 = vpop.permute.xlu1 %1202 }
 0x917   : > { %1904 = vmatmul.mubr.msk.f32.vlgmr.msra.gmra.mrb[10].mxu1 %vm354_vm0, %v1203_v9 }
 0x91a   : > { %v1282_v10 = vpop.permute.xlu1 %1281 }
 0x91b   : > { %1909 = vmatmul.mubr.msk.f32.vlgmr.msra.gmra.mrb[8].mxu0 %vm354_vm0, %v1282_v10 }
 0x91c   : > { %1913 = vmatprep.mubr.msk.f32.mxu0 %vm2088_vm2, %v2089_v5 }
 0x97e   : > { %v1177_v15 = vpop.f32.mrb[8].mxu1 }
 0x97f   : > { %v1870_v2 = vpop.f32.mrb[9].mxu1 }
 0x9ea   : > { %v1272_v18 = vpop.f32.mrb[10].mxu1 }
 0x9eb   : > { %1278 = vrot.lane.b32.xlu0 %v1272_v18, %s2090_s28  ;;  %v1905_v4 = vpop.f32.mrb[11].mxu1 }
 0x9ee   : > { %v1355_v21 = vpop.f32.mrb[8].mxu0 }
 0x9ef   : > { %v1910_v24 = vpop.f32.mrb[9].mxu0 }
 0xa5d   : > { %v1279_v27 = vpop.permute.xlu0 %1278 }
 0xa5e   : > { %v1356_v30 = vadd.f32 %v1355_v21, %v1279_v27 }
 0xa60   : > { %v1359_v14 = vsel %vm562_vm4, -1e+30, %v1356_v30 }
 0xa61   : > { %v1360_v16 = vsel %vm354_vm0, %v1359_v14, -inf }
 0xa62   : > { %1361 = vmax.xlane.f32.xlu1 %v1360_v16 }
 0xa73   : > { %1448 = vrot.lane.b32.xlu1 %v2432_v44, %s2092_s10  ;;  %s321_s10 = scalar_lea.vmem %s2525_s7, %s2179_s11 }
 0xa77   : > { %1452 = vrot.lane.b32.xlu1 %v1177_v15, %s2094_s20 }
 0xaef   : > { %v1362_v5 = vpop.xlane.xlu1 %1361 }
 0xaf0   : > { %v1363_v17 = vsub.f32 %v1359_v14, %v1362_v5 }
 0xaf2   : > { %v1364_v19 = vmul.f32 1.442695, %v1363_v17 }
 0xaf3   : > { %v1449_v31 = vpop.permute.xlu1 %1448 }
 0xaf4   : > { %2075 = vpow2.f32 %v1364_v19 }
 0xaf7   : > { %v1453_v32 = vpop.permute.xlu1 %1452 }
 0xafe   : > { %v2076_v20 = vpop.eup %2075 }
 0xaff   : > { %v1366_v22 = vsel %vm354_vm0, %v2076_v20, 0.0 }
 0xb00   : > { %1367 = vadd.xlane.f32.xlu0 %v1366_v22 }
 0xb16   : > { %1371 = vrot.lane.b32.xlu0 %v2312_v55, %s2097_s25  ;;  %v1459_v55 = vsel %vm354_vm0, %v2365_v6, %v1449_v31 }
 0xb17   : > { %v1461_v33 = vsel %vm1460_vm5, %v1459_v55, %v1453_v32 }
 0xb8d   : > { %v1368_v43 = vpop.xlane.xlu0 %1367 }
 0xb8e   : > { %2077 = vrcp.f32 %v1368_v43 }
 0xb91   : > { %v1372_v23 = vpop.permute.xlu0 %1371 }
 0xb92   : > { %1912 = vmatpush3.msra.mxu0 %v1372_v23 }
 0xb98   : > { %v2078_v25 = vpop.eup %2077 }
 0xb99   : > { %v1370_v26 = vmul.f32 %v2078_v25, %v2076_v20 }
 0xb9b   : > { %1914 = vmatmul.mubr.msk.f32.vlgmr.msra.gmra.mrb[10].mxu0 %vm354_vm0, %v1370_v26 }
 0xc6e   : > { %v1443_v28 = vpop.f32.mrb[10].mxu0 }
 0xc6f   : > { %1456 = vrot.lane.b32.xlu0 %v1443_v28, %s2096_s8  ;;  %v1915_v29 = vpop.f32.mrb[11].mxu0 }
 0xce1   : > { %v1457_v34 = vpop.permute.xlu0 %1456 }
 0xce2   : > { %v1463_v35 = vsel %vm1462_vm6, %v1461_v33, %v1457_v34 }
 0xce3   : > { %v1464_v36 = vadd.f32 %v1463_v35, %v2196_v11 }
 0xce5   : > { %1466 = vst.msk [vmem:[%s321_s10] sm:$0xff] %vm1465_vm7, %v1464_v36 }
 0xce6 PF: > { %s17_s24 = sadd.s32 1, %s2085_s24  }
 0xce7   : > { %p14_p4 = scmp.ge.s32.totalorder %s17_s24, 4  }
 0xce9   :  { %16 = sbr.rel (!%p14_p4) target bundleno = 1 (0x1), region = 87 }

</bundles_post_ra>
